<compile_context>
chip_gen: v7x
topology: tpu7x:2x2x1
jax: 0.10.0
libtpu: 0.0.40
codegen_flags: <defaults>
</compile_context>

<pallas_src>
import functools

import jax
import jax.numpy as jnp
from jax import lax
from jax.experimental import pallas as pl
from jax.experimental.pallas import tpu as pltpu


CPAD = 128          # padded channel width (lane-dense)
TILE_HW_MAX = 256   # max patch-rows per grid step (VMEM-safe on v5e/v6e/v7x)

# (cin, cout, kernel, stride, pad) -- small synthetic AlexNet-like backbone
STAGES = (
    (3, 8, 3, 2, 1),
    (8, 16, 3, 2, 1),
    (16, 24, 3, 1, 1),
    (24, 24, 3, 1, 1),
    (24, 16, 3, 1, 1),
)

_SHIFT = jnp.array([-0.030, -0.088, -0.188], jnp.float32)  # lpips ScalingLayer
_SCALE = jnp.array([0.458, 0.448, 0.450], jnp.float32)


def _round_up(x, m):
    return ((x + m - 1) // m) * m


# ------------------------------------------------------------------ fused stage kernel

def _stage_kernel(cols_a_ref, cols_b_ref, w_ref, b_ref, lin_ref,
                  feat_a_ref, feat_b_ref, dist_ref):
    # cols_*: (1, TILE_HW, Kp) bf16 im2col rows for the two images
    # w: (Kp, CPAD) bf16, b/lin: (1, CPAD) f32
    # feat_*: (1, TILE_HW, CPAD) bf16 features (input to the next stage)
    # dist:   (1, 1, CPAD) f32 accumulated lin-weighted squared diffs (per channel)
    t = pl.program_id(1)

    w = w_ref[...]
    b = b_ref[...]
    lin = lin_ref[...]

    # conv as matmul on the MXU (bf16 in, f32 accumulate) + bias + ReLU
    fa = jnp.maximum(
        jnp.dot(cols_a_ref[0], w, preferred_element_type=jnp.float32) + b, 0.0)
    fb = jnp.maximum(
        jnp.dot(cols_b_ref[0], w, preferred_element_type=jnp.float32) + b, 0.0)

    feat_a_ref[0] = fa.astype(feat_a_ref.dtype)
    feat_b_ref[0] = fb.astype(feat_b_ref.dtype)

    # channel-unit-normalize (rsqrt -> EUP), squared diff, lin-weighted
    # (padded channels are exactly zero, so sums are unchanged vs. unpadded)
    na = fa * lax.rsqrt(jnp.sum(fa * fa, axis=-1, keepdims=True) + 1e-20)
    nb = fb * lax.rsqrt(jnp.sum(fb * fb, axis=-1, keepdims=True) + 1e-20)
    d = (na - nb) ** 2
    partial = jnp.sum(d * lin, axis=0, keepdims=True)        # (1, CPAD)

    @pl.when(t == 0)
    def _():
        dist_ref[...] = jnp.zeros_like(dist_ref)

    dist_ref[...] += partial.reshape(dist_ref.shape)


def _stage_call(c0, c1, w, b, lin, tile_hw):
    n, hwp, kp = c0.shape
    grid = (n, hwp // tile_hw)
    return pl.pallas_call(
        _stage_kernel,
        out_shape=(
            jax.ShapeDtypeStruct((n, hwp, CPAD), jnp.bfloat16),
            jax.ShapeDtypeStruct((n, hwp, CPAD), jnp.bfloat16),
            jax.ShapeDtypeStruct((n, 1, CPAD), jnp.float32),
        ),
        grid=grid,
        in_specs=[
            pl.BlockSpec((1, tile_hw, kp), lambda i, t: (i, t, 0)),
            pl.BlockSpec((1, tile_hw, kp), lambda i, t: (i, t, 0)),
            pl.BlockSpec((kp, CPAD), lambda i, t: (0, 0)),
            pl.BlockSpec((1, CPAD), lambda i, t: (0, 0)),
            pl.BlockSpec((1, CPAD), lambda i, t: (0, 0)),
        ],
        out_specs=[
            pl.BlockSpec((1, tile_hw, CPAD), lambda i, t: (i, t, 0)),
            pl.BlockSpec((1, tile_hw, CPAD), lambda i, t: (i, t, 0)),
            pl.BlockSpec((1, 1, CPAD), lambda i, t: (i, 0, 0)),
        ],
        compiler_params=pltpu.CompilerParams(
            dimension_semantics=("parallel", "arbitrary")),
    )(c0, c1, w, b, lin)


# ------------------------------------------------------------------ glue (JAX)

def _im2col(x, k, stride, pad):
    """x: (N, H, W, C) -> (N, OH*OW, k*k*C) patch rows (NHWC tap order), plus OH, OW."""
    n, h, w, c = x.shape
    xp = jnp.pad(x, ((0, 0), (pad, pad), (pad, pad), (0, 0)))
    oh = (h + 2 * pad - k) // stride + 1
    ow = (w + 2 * pad - k) // stride + 1
    patches = []
    for i in range(k):
        for j in range(k):
            patches.append(
                xp[:, i:i + stride * oh:stride, j:j + stride * ow:stride, :])
    cols = jnp.concatenate(patches, axis=-1)            # (N, OH, OW, k*k*C)
    return cols.reshape(n, oh * ow, k * k * c), oh, ow


def init_params(key):
    """Synthetic backbone + lin weights, pre-padded to lane-dense (CPAD) layout."""
    convs, lins = [], []
    keys = jax.random.split(key, 2 * len(STAGES))
    for idx, (cin, cout, k, _, _) in enumerate(STAGES):
        wkey, lkey = keys[2 * idx], keys[2 * idx + 1]
        fan_in = k * k * cin
        w = jax.random.normal(wkey, (fan_in, cout), jnp.float32) * jnp.sqrt(2.0 / fan_in)
        b = jnp.zeros((cout,), jnp.float32)
        # lin weights in LPIPS are non-negative (1x1 conv, 1 out channel, no bias)
        lin = jax.random.uniform(lkey, (cout,), jnp.float32) / cout

        # embed into the padded physical layout the kernels see
        c_phys = cin if idx == 0 else CPAD               # physical input channels
        w_pad = jnp.zeros((k * k, c_phys, CPAD), jnp.float32)
        w_pad = w_pad.at[:, :cin, :cout].set(w.reshape(k * k, cin, cout))
        k_phys = k * k * c_phys
        kp = _round_up(k_phys, 128)
        w_pad = jnp.pad(w_pad.reshape(k_phys, CPAD), ((0, kp - k_phys), (0, 0)))
        b_pad = jnp.zeros((1, CPAD), jnp.float32).at[0, :cout].set(b)
        lin_pad = jnp.zeros((1, CPAD), jnp.float32).at[0, :cout].set(lin)

        convs.append((w_pad.astype(jnp.bfloat16), b_pad))
        lins.append(lin_pad)
    return {"convs": convs, "lins": lins}


def lpips_forward(img1, img2, params):
    """img1, img2: (N, H, W, 3) float32 in [0, 1]. Returns squeezed per-sample LPIPS."""
    # im2tensor ([0,1] -> [-1,1]) then ScalingLayer
    x0 = ((2.0 * img1 - 1.0) - _SHIFT) / _SCALE
    x1 = ((2.0 * img2 - 1.0) - _SHIFT) / _SCALE

    n = img1.shape[0]
    f0, f1 = x0, x1
    total = jnp.zeros((n,), jnp.float32)
    for (cin, cout, k, s, p), (w, b), lin in zip(STAGES, params["convs"], params["lins"]):
        c0, oh, ow = _im2col(f0.astype(jnp.bfloat16), k, s, p)   # bf16 MXU operands
        c1, _, _ = _im2col(f1.astype(jnp.bfloat16), k, s, p)
        hw = oh * ow
        kdim = c0.shape[-1]
        kp = _round_up(kdim, 128)                         # lane-dense K
        tile_hw = min(TILE_HW_MAX, _round_up(hw, 8))      # sublane-aligned M tile
        hwp = _round_up(hw, tile_hw)
        # zero-pad: padded rows give identical features for both images -> 0 distance
        c0 = jnp.pad(c0, ((0, 0), (0, hwp - hw), (0, kp - kdim)))
        c1 = jnp.pad(c1, ((0, 0), (0, hwp - hw), (0, kp - kdim)))

        feat0, feat1, dist = _stage_call(c0, c1, w, b, lin, tile_hw)

        # spatial average over the true OH*OW, channel sum of the lin-weighted diffs
        total = total + jnp.sum(dist, axis=(1, 2)) / float(hw)
        f0 = feat0[:, :hw, :].reshape(n, oh, ow, CPAD)
        f1 = feat1[:, :hw, :].reshape(n, oh, ow, CPAD)
    return jnp.squeeze(total)                             # matches .squeeze() in the module


# ------------------------------------------------------------------ main

if __name__ == "__main__":
    key = jax.random.PRNGKey(0)
    k_img1, k_img2, k_params = jax.random.split(key, 3)

    N, H, W = 2, 16, 16
    img1 = jax.random.uniform(k_img1, (N, H, W, 3), jnp.float32)  # images in [0, 1]
    img2 = jax.random.uniform(k_img2, (N, H, W, 3), jnp.float32)
    params = init_params(k_params)

    fwd = jax.jit(functools.partial(lpips_forward, params=params))
    out = jax.block_until_ready(fwd(img1, img2))

    assert out.shape == (N,), out.shape
    assert bool(jnp.all(jnp.isfinite(out)))
    print("KERNEL_OK")
</pallas_src>

<mosaic_0001>
module attributes {stable_mosaic.version = 11 : i64} {
  func.func @_stage_kernel(%arg0: i32, %arg1: i32, %arg2: memref<1x64x128xbf16, #tpu.memory_space<vmem>>, %arg3: memref<1x64x128xbf16, #tpu.memory_space<vmem>>, %arg4: memref<128x128xbf16, #tpu.memory_space<vmem>>, %arg5: memref<1x128xf32, #tpu.memory_space<vmem>>, %arg6: memref<1x128xf32, #tpu.memory_space<vmem>>, %arg7: memref<1x64x128xbf16, #tpu.memory_space<vmem>>, %arg8: memref<1x64x128xbf16, #tpu.memory_space<vmem>>, %arg9: memref<1x1x128xf32, #tpu.memory_space<vmem>>) attributes {dimension_semantics = [#tpu.dimension_semantics<parallel>, #tpu.dimension_semantics<arbitrary>], iteration_bounds = array<i64: 2, 1>, scalar_prefetch = 0 : i64, scratch_operands = 0 : i64, tpu.core_type = #tpu.core_type<tc>, window_params = [{transform_indices = @transform_0, window_bounds = array<i64: 1, 64, 128>}, {transform_indices = @transform_1, window_bounds = array<i64: 1, 64, 128>}, {pipeline_mode = #tpu.pipeline_mode<synchronous>, transform_indices = @transform_2, window_bounds = array<i64: 128, 128>}, {pipeline_mode = #tpu.pipeline_mode<synchronous>, transform_indices = @transform_3, window_bounds = array<i64: 1, 128>}, {pipeline_mode = #tpu.pipeline_mode<synchronous>, transform_indices = @transform_4, window_bounds = array<i64: 1, 128>}, {transform_indices = @transform_5, window_bounds = array<i64: 1, 64, 128>}, {transform_indices = @transform_6, window_bounds = array<i64: 1, 64, 128>}, {transform_indices = @transform_7, window_bounds = array<i64: 1, 1, 128>}]} {
    %c0 = arith.constant 0 : index
    %c0_0 = arith.constant 0 : index
    %0 = vector.load %arg4[%c0, %c0_0] : memref<128x128xbf16, #tpu.memory_space<vmem>>, vector<128x128xbf16>
    %c0_1 = arith.constant 0 : index
    %c0_2 = arith.constant 0 : index
    %1 = vector.load %arg5[%c0_1, %c0_2] : memref<1x128xf32, #tpu.memory_space<vmem>>, vector<1x128xf32>
    %c0_3 = arith.constant 0 : index
    %c0_4 = arith.constant 0 : index
    %2 = vector.load %arg6[%c0_3, %c0_4] : memref<1x128xf32, #tpu.memory_space<vmem>>, vector<1x128xf32>
    %c0_5 = arith.constant 0 : index
    %c0_6 = arith.constant 0 : index
    %c0_7 = arith.constant 0 : index
    %3 = vector.load %arg2[%c0_5, %c0_6, %c0_7] : memref<1x64x128xbf16, #tpu.memory_space<vmem>>, vector<1x64x128xbf16>
    %4 = vector.shape_cast %3 : vector<1x64x128xbf16> to vector<64x128xbf16>
    %cst = arith.constant dense<0.000000e+00> : vector<64x128xf32>
    %5 = tpu.matmul %4, %0, %cst {dimension_numbers = #tpu.dot_dimension_numbers<[1], [0], [0], [1], [0, 0, 1, 1], [], []>} : vector<64x128xbf16>, vector<128x128xbf16>, vector<64x128xf32> -> vector<64x128xf32>
    %6 = vector.broadcast %1 : vector<1x128xf32> to vector<64x128xf32>
    %7 = arith.addf %5, %6 : vector<64x128xf32>
    %cst_8 = arith.constant 0.000000e+00 : f32
    %8 = vector.broadcast %cst_8 : f32 to vector<64x128xf32>
    %9 = arith.maximumf %7, %8 : vector<64x128xf32>
    %c0_9 = arith.constant 0 : index
    %c0_10 = arith.constant 0 : index
    %c0_11 = arith.constant 0 : index
    %10 = vector.load %arg3[%c0_9, %c0_10, %c0_11] : memref<1x64x128xbf16, #tpu.memory_space<vmem>>, vector<1x64x128xbf16>
    %11 = vector.shape_cast %10 : vector<1x64x128xbf16> to vector<64x128xbf16>
    %cst_12 = arith.constant dense<0.000000e+00> : vector<64x128xf32>
    %12 = tpu.matmul %11, %0, %cst_12 {dimension_numbers = #tpu.dot_dimension_numbers<[1], [0], [0], [1], [0, 0, 1, 1], [], []>} : vector<64x128xbf16>, vector<128x128xbf16>, vector<64x128xf32> -> vector<64x128xf32>
    %13 = vector.broadcast %1 : vector<1x128xf32> to vector<64x128xf32>
    %14 = arith.addf %12, %13 : vector<64x128xf32>
    %cst_13 = arith.constant 0.000000e+00 : f32
    %15 = vector.broadcast %cst_13 : f32 to vector<64x128xf32>
    %16 = arith.maximumf %14, %15 : vector<64x128xf32>
    %17 = arith.truncf %9 : vector<64x128xf32> to vector<64x128xbf16>
    %c0_14 = arith.constant 0 : index
    %c0_15 = arith.constant 0 : index
    %c0_16 = arith.constant 0 : index
    %18 = vector.load %arg7[%c0_14, %c0_15, %c0_16] : memref<1x64x128xbf16, #tpu.memory_space<vmem>>, vector<1x64x128xbf16>
    %19 = vector.shape_cast %18 : vector<1x64x128xbf16> to vector<64x128xbf16>
    %20 = vector.shape_cast %17 : vector<64x128xbf16> to vector<1x64x128xbf16>
    tpu.vector_store %arg7[%c0_14, %c0_15, %c0_16], %20 {strides = array<i32>} : memref<1x64x128xbf16, #tpu.memory_space<vmem>>, vector<1x64x128xbf16>,
    %21 = arith.truncf %16 : vector<64x128xf32> to vector<64x128xbf16>
    %c0_17 = arith.constant 0 : index
    %c0_18 = arith.constant 0 : index
    %c0_19 = arith.constant 0 : index
    %22 = vector.load %arg8[%c0_17, %c0_18, %c0_19] : memref<1x64x128xbf16, #tpu.memory_space<vmem>>, vector<1x64x128xbf16>
    %23 = vector.shape_cast %22 : vector<1x64x128xbf16> to vector<64x128xbf16>
    %24 = vector.shape_cast %21 : vector<64x128xbf16> to vector<1x64x128xbf16>
    tpu.vector_store %arg8[%c0_17, %c0_18, %c0_19], %24 {strides = array<i32>} : memref<1x64x128xbf16, #tpu.memory_space<vmem>>, vector<1x64x128xbf16>,
    %25 = arith.mulf %9, %9 : vector<64x128xf32>
    %cst_20 = arith.constant dense<0.000000e+00> : vector<64xf32>
    %26 = vector.multi_reduction <add>, %25, %cst_20 [1] : vector<64x128xf32> to vector<64xf32>
    %27 = vector.shape_cast %26 : vector<64xf32> to vector<64x1xf32>
    %cst_21 = arith.constant 9.99999968E-21 : f32
    %28 = vector.broadcast %cst_21 : f32 to vector<64x1xf32>
    %29 = arith.addf %27, %28 : vector<64x1xf32>
    %30 = math.rsqrt %29 : vector<64x1xf32>
    %31 = vector.broadcast %30 : vector<64x1xf32> to vector<64x128xf32>
    %32 = arith.mulf %9, %31 : vector<64x128xf32>
    %33 = arith.mulf %16, %16 : vector<64x128xf32>
    %cst_22 = arith.constant dense<0.000000e+00> : vector<64xf32>
    %34 = vector.multi_reduction <add>, %33, %cst_22 [1] : vector<64x128xf32> to vector<64xf32>
    %35 = vector.shape_cast %34 : vector<64xf32> to vector<64x1xf32>
    %cst_23 = arith.constant 9.99999968E-21 : f32
    %36 = vector.broadcast %cst_23 : f32 to vector<64x1xf32>
    %37 = arith.addf %35, %36 : vector<64x1xf32>
    %38 = math.rsqrt %37 : vector<64x1xf32>
    %39 = vector.broadcast %38 : vector<64x1xf32> to vector<64x128xf32>
    %40 = arith.mulf %16, %39 : vector<64x128xf32>
    %41 = arith.subf %32, %40 : vector<64x128xf32>
    %42 = arith.mulf %41, %41 : vector<64x128xf32>
    %43 = vector.broadcast %2 : vector<1x128xf32> to vector<64x128xf32>
    %44 = arith.mulf %42, %43 : vector<64x128xf32>
    %cst_24 = arith.constant dense<0.000000e+00> : vector<128xf32>
    %45 = vector.multi_reduction <add>, %44, %cst_24 [0] : vector<64x128xf32> to vector<128xf32>
    %46 = vector.shape_cast %45 : vector<128xf32> to vector<1x128xf32>
    %c0_i32 = arith.constant 0 : i32
    %47 = arith.cmpi eq, %arg1, %c0_i32 : i32
    %48 = arith.extui %47 : i1 to i32
    %c0_i32_25 = arith.constant 0 : i32
    %49 = arith.cmpi ne, %48, %c0_i32_25 : i32
    scf.if %49 {
      %cst_32 = arith.constant 0.000000e+00 : f32
      %54 = vector.broadcast %cst_32 : f32 to vector<1x1x128xf32>
      %c0_33 = arith.constant 0 : index
      %c0_34 = arith.constant 0 : index
      %c0_35 = arith.constant 0 : index
      %55 = vector.load %arg9[%c0_33, %c0_34, %c0_35] : memref<1x1x128xf32, #tpu.memory_space<vmem>>, vector<1x1x128xf32>
      tpu.vector_store %arg9[%c0_33, %c0_34, %c0_35], %54 {strides = array<i32>} : memref<1x1x128xf32, #tpu.memory_space<vmem>>, vector<1x1x128xf32>,
    } else {
    }
    %c0_26 = arith.constant 0 : index
    %c0_27 = arith.constant 0 : index
    %c0_28 = arith.constant 0 : index
    %50 = vector.load %arg9[%c0_26, %c0_27, %c0_28] : memref<1x1x128xf32, #tpu.memory_space<vmem>>, vector<1x1x128xf32>
    %51 = vector.shape_cast %46 : vector<1x128xf32> to vector<1x1x128xf32>
    %52 = arith.addf %50, %51 : vector<1x1x128xf32>
    %c0_29 = arith.constant 0 : index
    %c0_30 = arith.constant 0 : index
    %c0_31 = arith.constant 0 : index
    %53 = vector.load %arg9[%c0_29, %c0_30, %c0_31] : memref<1x1x128xf32, #tpu.memory_space<vmem>>, vector<1x1x128xf32>
    tpu.vector_store %arg9[%c0_29, %c0_30, %c0_31], %52 {strides = array<i32>} : memref<1x1x128xf32, #tpu.memory_space<vmem>>, vector<1x1x128xf32>,
    return
  }
  func.func @transform_0(%arg0: i32, %arg1: i32) -> (i32, i32, i32) {
    %c0_i32 = arith.constant 0 : i32
    %c0_i32_0 = arith.constant 0 : i32
    return %arg0, %arg1, %c0_i32 : i32, i32, i32
  }
  func.func @transform_1(%arg0: i32, %arg1: i32) -> (i32, i32, i32) {
    %c0_i32 = arith.constant 0 : i32
    %c0_i32_0 = arith.constant 0 : i32
    return %arg0, %arg1, %c0_i32 : i32, i32, i32
  }
  func.func @transform_2(%arg0: i32, %arg1: i32) -> (i32, i32) {
    %c0_i32 = arith.constant 0 : i32
    %c0_i32_0 = arith.constant 0 : i32
    %c0_i32_1 = arith.constant 0 : i32
    return %c0_i32, %c0_i32_0 : i32, i32
  }
  func.func @transform_3(%arg0: i32, %arg1: i32) -> (i32, i32) {
    %c0_i32 = arith.constant 0 : i32
    %c0_i32_0 = arith.constant 0 : i32
    %c0_i32_1 = arith.constant 0 : i32
    return %c0_i32, %c0_i32_0 : i32, i32
  }
  func.func @transform_4(%arg0: i32, %arg1: i32) -> (i32, i32) {
    %c0_i32 = arith.constant 0 : i32
    %c0_i32_0 = arith.constant 0 : i32
    %c0_i32_1 = arith.constant 0 : i32
    return %c0_i32, %c0_i32_0 : i32, i32
  }
  func.func @transform_5(%arg0: i32, %arg1: i32) -> (i32, i32, i32) {
    %c0_i32 = arith.constant 0 : i32
    %c0_i32_0 = arith.constant 0 : i32
    return %arg0, %arg1, %c0_i32 : i32, i32, i32
  }
  func.func @transform_6(%arg0: i32, %arg1: i32) -> (i32, i32, i32) {
    %c0_i32 = arith.constant 0 : i32
    %c0_i32_0 = arith.constant 0 : i32
    return %arg0, %arg1, %c0_i32 : i32, i32, i32
  }
  func.func @transform_7(%arg0: i32, %arg1: i32) -> (i32, i32, i32) {
    %c0_i32 = arith.constant 0 : i32
    %c0_i32_0 = arith.constant 0 : i32
    %c0_i32_1 = arith.constant 0 : i32
    return %arg0, %c0_i32, %c0_i32_0 : i32, i32, i32
  }
}

module attributes {stable_mosaic.version = 11 : i64} {
  func.func @_stage_kernel(%arg0: i32, %arg1: i32, %arg2: memref<1x16x1152xbf16, #tpu.memory_space<vmem>>, %arg3: memref<1x16x1152xbf16, #tpu.memory_space<vmem>>, %arg4: memref<1152x128xbf16, #tpu.memory_space<vmem>>, %arg5: memref<1x128xf32, #tpu.memory_space<vmem>>, %arg6: memref<1x128xf32, #tpu.memory_space<vmem>>, %arg7: memref<1x16x128xbf16, #tpu.memory_space<vmem>>, %arg8: memref<1x16x128xbf16, #tpu.memory_space<vmem>>, %arg9: memref<1x1x128xf32, #tpu.memory_space<vmem>>) attributes {dimension_semantics = [#tpu.dimension_semantics<parallel>, #tpu.dimension_semantics<arbitrary>], iteration_bounds = array<i64: 2, 1>, scalar_prefetch = 0 : i64, scratch_operands = 0 : i64, tpu.core_type = #tpu.core_type<tc>, window_params = [{transform_indices = @transform_0, window_bounds = array<i64: 1, 16, 1152>}, {transform_indices = @transform_1, window_bounds = array<i64: 1, 16, 1152>}, {pipeline_mode = #tpu.pipeline_mode<synchronous>, transform_indices = @transform_2, window_bounds = array<i64: 1152, 128>}, {pipeline_mode = #tpu.pipeline_mode<synchronous>, transform_indices = @transform_3, window_bounds = array<i64: 1, 128>}, {pipeline_mode = #tpu.pipeline_mode<synchronous>, transform_indices = @transform_4, window_bounds = array<i64: 1, 128>}, {transform_indices = @transform_5, window_bounds = array<i64: 1, 16, 128>}, {transform_indices = @transform_6, window_bounds = array<i64: 1, 16, 128>}, {transform_indices = @transform_7, window_bounds = array<i64: 1, 1, 128>}]} {
    %c0 = arith.constant 0 : index
    %c0_0 = arith.constant 0 : index
    %0 = vector.load %arg4[%c0, %c0_0] : memref<1152x128xbf16, #tpu.memory_space<vmem>>, vector<1152x128xbf16>
    %c0_1 = arith.constant 0 : index
    %c0_2 = arith.constant 0 : index
    %1 = vector.load %arg5[%c0_1, %c0_2] : memref<1x128xf32, #tpu.memory_space<vmem>>, vector<1x128xf32>
    %c0_3 = arith.constant 0 : index
    %c0_4 = arith.constant 0 : index
    %2 = vector.load %arg6[%c0_3, %c0_4] : memref<1x128xf32, #tpu.memory_space<vmem>>, vector<1x128xf32>
    %c0_5 = arith.constant 0 : index
    %c0_6 = arith.constant 0 : index
    %c0_7 = arith.constant 0 : index
    %3 = vector.load %arg2[%c0_5, %c0_6, %c0_7] : memref<1x16x1152xbf16, #tpu.memory_space<vmem>>, vector<1x16x1152xbf16>
    %4 = vector.shape_cast %3 : vector<1x16x1152xbf16> to vector<16x1152xbf16>
    %cst = arith.constant dense<0.000000e+00> : vector<16x128xf32>
    %5 = tpu.matmul %4, %0, %cst {dimension_numbers = #tpu.dot_dimension_numbers<[1], [0], [0], [1], [0, 0, 1, 1], [], []>} : vector<16x1152xbf16>, vector<1152x128xbf16>, vector<16x128xf32> -> vector<16x128xf32>
    %6 = vector.broadcast %1 : vector<1x128xf32> to vector<16x128xf32>
    %7 = arith.addf %5, %6 : vector<16x128xf32>
    %cst_8 = arith.constant 0.000000e+00 : f32
    %8 = vector.broadcast %cst_8 : f32 to vector<16x128xf32>
    %9 = arith.maximumf %7, %8 : vector<16x128xf32>
    %c0_9 = arith.constant 0 : index
    %c0_10 = arith.constant 0 : index
    %c0_11 = arith.constant 0 : index
    %10 = vector.load %arg3[%c0_9, %c0_10, %c0_11] : memref<1x16x1152xbf16, #tpu.memory_space<vmem>>, vector<1x16x1152xbf16>
    %11 = vector.shape_cast %10 : vector<1x16x1152xbf16> to vector<16x1152xbf16>
    %cst_12 = arith.constant dense<0.000000e+00> : vector<16x128xf32>
    %12 = tpu.matmul %11, %0, %cst_12 {dimension_numbers = #tpu.dot_dimension_numbers<[1], [0], [0], [1], [0, 0, 1, 1], [], []>} : vector<16x1152xbf16>, vector<1152x128xbf16>, vector<16x128xf32> -> vector<16x128xf32>
    %13 = vector.broadcast %1 : vector<1x128xf32> to vector<16x128xf32>
    %14 = arith.addf %12, %13 : vector<16x128xf32>
    %cst_13 = arith.constant 0.000000e+00 : f32
    %15 = vector.broadcast %cst_13 : f32 to vector<16x128xf32>
    %16 = arith.maximumf %14, %15 : vector<16x128xf32>
    %17 = arith.truncf %9 : vector<16x128xf32> to vector<16x128xbf16>
    %c0_14 = arith.constant 0 : index
    %c0_15 = arith.constant 0 : index
    %c0_16 = arith.constant 0 : index
    %18 = vector.load %arg7[%c0_14, %c0_15, %c0_16] : memref<1x16x128xbf16, #tpu.memory_space<vmem>>, vector<1x16x128xbf16>
    %19 = vector.shape_cast %18 : vector<1x16x128xbf16> to vector<16x128xbf16>
    %20 = vector.shape_cast %17 : vector<16x128xbf16> to vector<1x16x128xbf16>
    tpu.vector_store %arg7[%c0_14, %c0_15, %c0_16], %20 {strides = array<i32>} : memref<1x16x128xbf16, #tpu.memory_space<vmem>>, vector<1x16x128xbf16>,
    %21 = arith.truncf %16 : vector<16x128xf32> to vector<16x128xbf16>
    %c0_17 = arith.constant 0 : index
    %c0_18 = arith.constant 0 : index
    %c0_19 = arith.constant 0 : index
    %22 = vector.load %arg8[%c0_17, %c0_18, %c0_19] : memref<1x16x128xbf16, #tpu.memory_space<vmem>>, vector<1x16x128xbf16>
    %23 = vector.shape_cast %22 : vector<1x16x128xbf16> to vector<16x128xbf16>
    %24 = vector.shape_cast %21 : vector<16x128xbf16> to vector<1x16x128xbf16>
    tpu.vector_store %arg8[%c0_17, %c0_18, %c0_19], %24 {strides = array<i32>} : memref<1x16x128xbf16, #tpu.memory_space<vmem>>, vector<1x16x128xbf16>,
    %25 = arith.mulf %9, %9 : vector<16x128xf32>
    %cst_20 = arith.constant dense<0.000000e+00> : vector<16xf32>
    %26 = vector.multi_reduction <add>, %25, %cst_20 [1] : vector<16x128xf32> to vector<16xf32>
    %27 = vector.shape_cast %26 : vector<16xf32> to vector<16x1xf32>
    %cst_21 = arith.constant 9.99999968E-21 : f32
    %28 = vector.broadcast %cst_21 : f32 to vector<16x1xf32>
    %29 = arith.addf %27, %28 : vector<16x1xf32>
    %30 = math.rsqrt %29 : vector<16x1xf32>
    %31 = vector.broadcast %30 : vector<16x1xf32> to vector<16x128xf32>
    %32 = arith.mulf %9, %31 : vector<16x128xf32>
    %33 = arith.mulf %16, %16 : vector<16x128xf32>
    %cst_22 = arith.constant dense<0.000000e+00> : vector<16xf32>
    %34 = vector.multi_reduction <add>, %33, %cst_22 [1] : vector<16x128xf32> to vector<16xf32>
    %35 = vector.shape_cast %34 : vector<16xf32> to vector<16x1xf32>
    %cst_23 = arith.constant 9.99999968E-21 : f32
    %36 = vector.broadcast %cst_23 : f32 to vector<16x1xf32>
    %37 = arith.addf %35, %36 : vector<16x1xf32>
    %38 = math.rsqrt %37 : vector<16x1xf32>
    %39 = vector.broadcast %38 : vector<16x1xf32> to vector<16x128xf32>
    %40 = arith.mulf %16, %39 : vector<16x128xf32>
    %41 = arith.subf %32, %40 : vector<16x128xf32>
    %42 = arith.mulf %41, %41 : vector<16x128xf32>
    %43 = vector.broadcast %2 : vector<1x128xf32> to vector<16x128xf32>
    %44 = arith.mulf %42, %43 : vector<16x128xf32>
    %cst_24 = arith.constant dense<0.000000e+00> : vector<128xf32>
    %45 = vector.multi_reduction <add>, %44, %cst_24 [0] : vector<16x128xf32> to vector<128xf32>
    %46 = vector.shape_cast %45 : vector<128xf32> to vector<1x128xf32>
    %c0_i32 = arith.constant 0 : i32
    %47 = arith.cmpi eq, %arg1, %c0_i32 : i32
    %48 = arith.extui %47 : i1 to i32
    %c0_i32_25 = arith.constant 0 : i32
    %49 = arith.cmpi ne, %48, %c0_i32_25 : i32
    scf.if %49 {
      %cst_32 = arith.constant 0.000000e+00 : f32
      %54 = vector.broadcast %cst_32 : f32 to vector<1x1x128xf32>
      %c0_33 = arith.constant 0 : index
      %c0_34 = arith.constant 0 : index
      %c0_35 = arith.constant 0 : index
      %55 = vector.load %arg9[%c0_33, %c0_34, %c0_35] : memref<1x1x128xf32, #tpu.memory_space<vmem>>, vector<1x1x128xf32>
      tpu.vector_store %arg9[%c0_33, %c0_34, %c0_35], %54 {strides = array<i32>} : memref<1x1x128xf32, #tpu.memory_space<vmem>>, vector<1x1x128xf32>,
    } else {
    }
    %c0_26 = arith.constant 0 : index
    %c0_27 = arith.constant 0 : index
    %c0_28 = arith.constant 0 : index
    %50 = vector.load %arg9[%c0_26, %c0_27, %c0_28] : memref<1x1x128xf32, #tpu.memory_space<vmem>>, vector<1x1x128xf32>
    %51 = vector.shape_cast %46 : vector<1x128xf32> to vector<1x1x128xf32>
    %52 = arith.addf %50, %51 : vector<1x1x128xf32>
    %c0_29 = arith.constant 0 : index
    %c0_30 = arith.constant 0 : index
    %c0_31 = arith.constant 0 : index
    %53 = vector.load %arg9[%c0_29, %c0_30, %c0_31] : memref<1x1x128xf32, #tpu.memory_space<vmem>>, vector<1x1x128xf32>
    tpu.vector_store %arg9[%c0_29, %c0_30, %c0_31], %52 {strides = array<i32>} : memref<1x1x128xf32, #tpu.memory_space<vmem>>, vector<1x1x128xf32>,
    return
  }
  func.func @transform_0(%arg0: i32, %arg1: i32) -> (i32, i32, i32) {
    %c0_i32 = arith.constant 0 : i32
    %c0_i32_0 = arith.constant 0 : i32
    return %arg0, %arg1, %c0_i32 : i32, i32, i32
  }
  func.func @transform_1(%arg0: i32, %arg1: i32) -> (i32, i32, i32) {
    %c0_i32 = arith.constant 0 : i32
    %c0_i32_0 = arith.constant 0 : i32
    return %arg0, %arg1, %c0_i32 : i32, i32, i32
  }
  func.func @transform_2(%arg0: i32, %arg1: i32) -> (i32, i32) {
    %c0_i32 = arith.constant 0 : i32
    %c0_i32_0 = arith.constant 0 : i32
    %c0_i32_1 = arith.constant 0 : i32
    return %c0_i32, %c0_i32_0 : i32, i32
  }
  func.func @transform_3(%arg0: i32, %arg1: i32) -> (i32, i32) {
    %c0_i32 = arith.constant 0 : i32
    %c0_i32_0 = arith.constant 0 : i32
    %c0_i32_1 = arith.constant 0 : i32
    return %c0_i32, %c0_i32_0 : i32, i32
  }
  func.func @transform_4(%arg0: i32, %arg1: i32) -> (i32, i32) {
    %c0_i32 = arith.constant 0 : i32
    %c0_i32_0 = arith.constant 0 : i32
    %c0_i32_1 = arith.constant 0 : i32
    return %c0_i32, %c0_i32_0 : i32, i32
  }
  func.func @transform_5(%arg0: i32, %arg1: i32) -> (i32, i32, i32) {
    %c0_i32 = arith.constant 0 : i32
    %c0_i32_0 = arith.constant 0 : i32
    return %arg0, %arg1, %c0_i32 : i32, i32, i32
  }
  func.func @transform_6(%arg0: i32, %arg1: i32) -> (i32, i32, i32) {
    %c0_i32 = arith.constant 0 : i32
    %c0_i32_0 = arith.constant 0 : i32
    return %arg0, %arg1, %c0_i32 : i32, i32, i32
  }
  func.func @transform_7(%arg0: i32, %arg1: i32) -> (i32, i32, i32) {
    %c0_i32 = arith.constant 0 : i32
    %c0_i32_0 = arith.constant 0 : i32
    %c0_i32_1 = arith.constant 0 : i32
    return %arg0, %c0_i32, %c0_i32_0 : i32, i32, i32
  }
}

module attributes {stable_mosaic.version = 11 : i64} {
  func.func @_stage_kernel(%arg0: i32, %arg1: i32, %arg2: memref<1x16x1152xbf16, #tpu.memory_space<vmem>>, %arg3: memref<1x16x1152xbf16, #tpu.memory_space<vmem>>, %arg4: memref<1152x128xbf16, #tpu.memory_space<vmem>>, %arg5: memref<1x128xf32, #tpu.memory_space<vmem>>, %arg6: memref<1x128xf32, #tpu.memory_space<vmem>>, %arg7: memref<1x16x128xbf16, #tpu.memory_space<vmem>>, %arg8: memref<1x16x128xbf16, #tpu.memory_space<vmem>>, %arg9: memref<1x1x128xf32, #tpu.memory_space<vmem>>) attributes {dimension_semantics = [#tpu.dimension_semantics<parallel>, #tpu.dimension_semantics<arbitrary>], iteration_bounds = array<i64: 2, 1>, scalar_prefetch = 0 : i64, scratch_operands = 0 : i64, tpu.core_type = #tpu.core_type<tc>, window_params = [{transform_indices = @transform_0, window_bounds = array<i64: 1, 16, 1152>}, {transform_indices = @transform_1, window_bounds = array<i64: 1, 16, 1152>}, {pipeline_mode = #tpu.pipeline_mode<synchronous>, transform_indices = @transform_2, window_bounds = array<i64: 1152, 128>}, {pipeline_mode = #tpu.pipeline_mode<synchronous>, transform_indices = @transform_3, window_bounds = array<i64: 1, 128>}, {pipeline_mode = #tpu.pipeline_mode<synchronous>, transform_indices = @transform_4, window_bounds = array<i64: 1, 128>}, {transform_indices = @transform_5, window_bounds = array<i64: 1, 16, 128>}, {transform_indices = @transform_6, window_bounds = array<i64: 1, 16, 128>}, {transform_indices = @transform_7, window_bounds = array<i64: 1, 1, 128>}]} {
    %c0 = arith.constant 0 : index
    %c0_0 = arith.constant 0 : index
    %0 = vector.load %arg4[%c0, %c0_0] : memref<1152x128xbf16, #tpu.memory_space<vmem>>, vector<1152x128xbf16>
    %c0_1 = arith.constant 0 : index
    %c0_2 = arith.constant 0 : index
    %1 = vector.load %arg5[%c0_1, %c0_2] : memref<1x128xf32, #tpu.memory_space<vmem>>, vector<1x128xf32>
    %c0_3 = arith.constant 0 : index
    %c0_4 = arith.constant 0 : index
    %2 = vector.load %arg6[%c0_3, %c0_4] : memref<1x128xf32, #tpu.memory_space<vmem>>, vector<1x128xf32>
    %c0_5 = arith.constant 0 : index
    %c0_6 = arith.constant 0 : index
    %c0_7 = arith.constant 0 : index
    %3 = vector.load %arg2[%c0_5, %c0_6, %c0_7] : memref<1x16x1152xbf16, #tpu.memory_space<vmem>>, vector<1x16x1152xbf16>
    %4 = vector.shape_cast %3 : vector<1x16x1152xbf16> to vector<16x1152xbf16>
    %cst = arith.constant dense<0.000000e+00> : vector<16x128xf32>
    %5 = tpu.matmul %4, %0, %cst {dimension_numbers = #tpu.dot_dimension_numbers<[1], [0], [0], [1], [0, 0, 1, 1], [], []>} : vector<16x1152xbf16>, vector<1152x128xbf16>, vector<16x128xf32> -> vector<16x128xf32>
    %6 = vector.broadcast %1 : vector<1x128xf32> to vector<16x128xf32>
    %7 = arith.addf %5, %6 : vector<16x128xf32>
    %cst_8 = arith.constant 0.000000e+00 : f32
    %8 = vector.broadcast %cst_8 : f32 to vector<16x128xf32>
    %9 = arith.maximumf %7, %8 : vector<16x128xf32>
    %c0_9 = arith.constant 0 : index
    %c0_10 = arith.constant 0 : index
    %c0_11 = arith.constant 0 : index
    %10 = vector.load %arg3[%c0_9, %c0_10, %c0_11] : memref<1x16x1152xbf16, #tpu.memory_space<vmem>>, vector<1x16x1152xbf16>
    %11 = vector.shape_cast %10 : vector<1x16x1152xbf16> to vector<16x1152xbf16>
    %cst_12 = arith.constant dense<0.000000e+00> : vector<16x128xf32>
    %12 = tpu.matmul %11, %0, %cst_12 {dimension_numbers = #tpu.dot_dimension_numbers<[1], [0], [0], [1], [0, 0, 1, 1], [], []>} : vector<16x1152xbf16>, vector<1152x128xbf16>, vector<16x128xf32> -> vector<16x128xf32>
    %13 = vector.broadcast %1 : vector<1x128xf32> to vector<16x128xf32>
    %14 = arith.addf %12, %13 : vector<16x128xf32>
    %cst_13 = arith.constant 0.000000e+00 : f32
    %15 = vector.broadcast %cst_13 : f32 to vector<16x128xf32>
    %16 = arith.maximumf %14, %15 : vector<16x128xf32>
    %17 = arith.truncf %9 : vector<16x128xf32> to vector<16x128xbf16>
    %c0_14 = arith.constant 0 : index
    %c0_15 = arith.constant 0 : index
    %c0_16 = arith.constant 0 : index
    %18 = vector.load %arg7[%c0_14, %c0_15, %c0_16] : memref<1x16x128xbf16, #tpu.memory_space<vmem>>, vector<1x16x128xbf16>
    %19 = vector.shape_cast %18 : vector<1x16x128xbf16> to vector<16x128xbf16>
    %20 = vector.shape_cast %17 : vector<16x128xbf16> to vector<1x16x128xbf16>
    tpu.vector_store %arg7[%c0_14, %c0_15, %c0_16], %20 {strides = array<i32>} : memref<1x16x128xbf16, #tpu.memory_space<vmem>>, vector<1x16x128xbf16>,
    %21 = arith.truncf %16 : vector<16x128xf32> to vector<16x128xbf16>
    %c0_17 = arith.constant 0 : index
    %c0_18 = arith.constant 0 : index
    %c0_19 = arith.constant 0 : index
    %22 = vector.load %arg8[%c0_17, %c0_18, %c0_19] : memref<1x16x128xbf16, #tpu.memory_space<vmem>>, vector<1x16x128xbf16>
    %23 = vector.shape_cast %22 : vector<1x16x128xbf16> to vector<16x128xbf16>
    %24 = vector.shape_cast %21 : vector<16x128xbf16> to vector<1x16x128xbf16>
    tpu.vector_store %arg8[%c0_17, %c0_18, %c0_19], %24 {strides = array<i32>} : memref<1x16x128xbf16, #tpu.memory_space<vmem>>, vector<1x16x128xbf16>,
    %25 = arith.mulf %9, %9 : vector<16x128xf32>
    %cst_20 = arith.constant dense<0.000000e+00> : vector<16xf32>
    %26 = vector.multi_reduction <add>, %25, %cst_20 [1] : vector<16x128xf32> to vector<16xf32>
    %27 = vector.shape_cast %26 : vector<16xf32> to vector<16x1xf32>
    %cst_21 = arith.constant 9.99999968E-21 : f32
    %28 = vector.broadcast %cst_21 : f32 to vector<16x1xf32>
    %29 = arith.addf %27, %28 : vector<16x1xf32>
    %30 = math.rsqrt %29 : vector<16x1xf32>
    %31 = vector.broadcast %30 : vector<16x1xf32> to vector<16x128xf32>
    %32 = arith.mulf %9, %31 : vector<16x128xf32>
    %33 = arith.mulf %16, %16 : vector<16x128xf32>
    %cst_22 = arith.constant dense<0.000000e+00> : vector<16xf32>
    %34 = vector.multi_reduction <add>, %33, %cst_22 [1] : vector<16x128xf32> to vector<16xf32>
    %35 = vector.shape_cast %34 : vector<16xf32> to vector<16x1xf32>
    %cst_23 = arith.constant 9.99999968E-21 : f32
    %36 = vector.broadcast %cst_23 : f32 to vector<16x1xf32>
    %37 = arith.addf %35, %36 : vector<16x1xf32>
    %38 = math.rsqrt %37 : vector<16x1xf32>
    %39 = vector.broadcast %38 : vector<16x1xf32> to vector<16x128xf32>
    %40 = arith.mulf %16, %39 : vector<16x128xf32>
    %41 = arith.subf %32, %40 : vector<16x128xf32>
    %42 = arith.mulf %41, %41 : vector<16x128xf32>
    %43 = vector.broadcast %2 : vector<1x128xf32> to vector<16x128xf32>
    %44 = arith.mulf %42, %43 : vector<16x128xf32>
    %cst_24 = arith.constant dense<0.000000e+00> : vector<128xf32>
    %45 = vector.multi_reduction <add>, %44, %cst_24 [0] : vector<16x128xf32> to vector<128xf32>
    %46 = vector.shape_cast %45 : vector<128xf32> to vector<1x128xf32>
    %c0_i32 = arith.constant 0 : i32
    %47 = arith.cmpi eq, %arg1, %c0_i32 : i32
    %48 = arith.extui %47 : i1 to i32
    %c0_i32_25 = arith.constant 0 : i32
    %49 = arith.cmpi ne, %48, %c0_i32_25 : i32
    scf.if %49 {
      %cst_32 = arith.constant 0.000000e+00 : f32
      %54 = vector.broadcast %cst_32 : f32 to vector<1x1x128xf32>
      %c0_33 = arith.constant 0 : index
      %c0_34 = arith.constant 0 : index
      %c0_35 = arith.constant 0 : index
      %55 = vector.load %arg9[%c0_33, %c0_34, %c0_35] : memref<1x1x128xf32, #tpu.memory_space<vmem>>, vector<1x1x128xf32>
      tpu.vector_store %arg9[%c0_33, %c0_34, %c0_35], %54 {strides = array<i32>} : memref<1x1x128xf32, #tpu.memory_space<vmem>>, vector<1x1x128xf32>,
    } else {
    }
    %c0_26 = arith.constant 0 : index
    %c0_27 = arith.constant 0 : index
    %c0_28 = arith.constant 0 : index
    %50 = vector.load %arg9[%c0_26, %c0_27, %c0_28] : memref<1x1x128xf32, #tpu.memory_space<vmem>>, vector<1x1x128xf32>
    %51 = vector.shape_cast %46 : vector<1x128xf32> to vector<1x1x128xf32>
    %52 = arith.addf %50, %51 : vector<1x1x128xf32>
    %c0_29 = arith.constant 0 : index
    %c0_30 = arith.constant 0 : index
    %c0_31 = arith.constant 0 : index
    %53 = vector.load %arg9[%c0_29, %c0_30, %c0_31] : memref<1x1x128xf32, #tpu.memory_space<vmem>>, vector<1x1x128xf32>
    tpu.vector_store %arg9[%c0_29, %c0_30, %c0_31], %52 {strides = array<i32>} : memref<1x1x128xf32, #tpu.memory_space<vmem>>, vector<1x1x128xf32>,
    return
  }
  func.func @transform_0(%arg0: i32, %arg1: i32) -> (i32, i32, i32) {
    %c0_i32 = arith.constant 0 : i32
    %c0_i32_0 = arith.constant 0 : i32
    return %arg0, %arg1, %c0_i32 : i32, i32, i32
  }
  func.func @transform_1(%arg0: i32, %arg1: i32) -> (i32, i32, i32) {
    %c0_i32 = arith.constant 0 : i32
    %c0_i32_0 = arith.constant 0 : i32
    return %arg0, %arg1, %c0_i32 : i32, i32, i32
  }
  func.func @transform_2(%arg0: i32, %arg1: i32) -> (i32, i32) {
    %c0_i32 = arith.constant 0 : i32
    %c0_i32_0 = arith.constant 0 : i32
    %c0_i32_1 = arith.constant 0 : i32
    return %c0_i32, %c0_i32_0 : i32, i32
  }
  func.func @transform_3(%arg0: i32, %arg1: i32) -> (i32, i32) {
    %c0_i32 = arith.constant 0 : i32
    %c0_i32_0 = arith.constant 0 : i32
    %c0_i32_1 = arith.constant 0 : i32
    return %c0_i32, %c0_i32_0 : i32, i32
  }
  func.func @transform_4(%arg0: i32, %arg1: i32) -> (i32, i32) {
    %c0_i32 = arith.constant 0 : i32
    %c0_i32_0 = arith.constant 0 : i32
    %c0_i32_1 = arith.constant 0 : i32
    return %c0_i32, %c0_i32_0 : i32, i32
  }
  func.func @transform_5(%arg0: i32, %arg1: i32) -> (i32, i32, i32) {
    %c0_i32 = arith.constant 0 : i32
    %c0_i32_0 = arith.constant 0 : i32
    return %arg0, %arg1, %c0_i32 : i32, i32, i32
  }
  func.func @transform_6(%arg0: i32, %arg1: i32) -> (i32, i32, i32) {
    %c0_i32 = arith.constant 0 : i32
    %c0_i32_0 = arith.constant 0 : i32
    return %arg0, %arg1, %c0_i32 : i32, i32, i32
  }
  func.func @transform_7(%arg0: i32, %arg1: i32) -> (i32, i32, i32) {
    %c0_i32 = arith.constant 0 : i32
    %c0_i32_0 = arith.constant 0 : i32
    %c0_i32_1 = arith.constant 0 : i32
    return %arg0, %c0_i32, %c0_i32_0 : i32, i32, i32
  }
}

</mosaic_0001>

<bundles_post_ra>
// kernel: lpips_forward.5
= control target key start
LH: loop header
LB: loop body
LE: loop exit
PB: predicated region body
PF: predicated region fallthrough
CT: control target
= control target key end

     0   :  { %s1401_s24 = smov 0   ;;  %s1403_s25 = smov 0   ;;  %s1604_s0 = inlined_call_operand.vmem [shape: bf16[2,64,128], index: 0, kind: input, shape index: {}]   ;;  %s1605_s1 = inlined_call_operand.vmem [shape: bf16[2,64,128], index: 1, kind: input, shape index: {}]   ;;  %s1606_s2 = inlined_call_operand.vmem [shape: bf16[128,128], index: 2, kind: input, shape index: {}]   ;;  %s1607_s3 = inlined_call_operand.vmem [shape: f32[1,128], index: 3, kind: input, shape index: {}]   ;;  %s1608_s4 = inlined_call_operand.vmem [shape: f32[1,128], index: 4, kind: input, shape index: {}]   ;;  %s1609_s5 = inlined_call_operand.vmem [shape: bf16[2,64,128], index: 5, kind: output, shape index: {0}]   ;;  %s1610_s6 = inlined_call_operand.vmem [shape: bf16[2,64,128], index: 6, kind: output, shape index: {1}]   ;;  %s1611_s7 = inlined_call_operand.vmem [shape: f32[2,1,128], index: 7, kind: output, shape index: {2}]  }
   0x1   :  { %s1405_s26 = smov 0  }
   0x2 LB: > { %s30_s27 = sadd.s32 1, %s1354_s25  ;;  %p1080_p0 = scmp.ge.s32.totalorder %s1358_s26, 1  ;;  %s1358_s26 = sphi %s1405_s26, %s18_s26   ;;  %s1354_s25 = sphi %s1403_s25, %s1613_s25   ;;  %s1350_s24 = sphi %s1401_s24, %s1612_s24  }
   0x3   : > { %p32_p1 = scmp.ge.s32.totalorder %s30_s27, 2  ;;  %p282_p2 = scmp.lt.s32.totalorder %s1358_s26, 3 }
   0x5   : > { %s1615_s27 = smov (%p32_p1, %s30_s27), 0  ;;  %p283_p3 = pnand %p1080_p0, %p282_p2 }
   0x6   : > { %v1288_v0 = vld [vmem:[%s1606_s2] sm:$0xff] (!%p283_p3)   ;;  %p344_p4 = scmp.lt.s32.totalorder (!%p283_p3), %s1350_s24, 1  ;;  %v1289_v1 = vld [vmem:[%s1606_s2 + $0x8] sm:$0xff] (!%p283_p3)   ;;  %v1290_v2 = vld [vmem:[%s1606_s2 + $0x10] sm:$0xff] (!%p283_p3)   ;;  %v1360_v3 = vmov (!%p283_p3), 0.0  }
   0x7   : > { %286 = sbr.rel (%p283_p3) target bundleno = 466 (0x1d2), region = 40  ;;  %1215 = vmatprep.subr.bf16.mxu0 (!%p283_p3), %v1288_v0  ;;  %1239 = vmatprep.subr.bf16.mxu1 (!%p283_p3), %v1288_v0  ;;  %v1291_v4 = vld [vmem:[%s1606_s2 + $0x18] sm:$0xff] (!%p283_p3)   ;;  %v1292_v7 = vld [vmem:[%s1606_s2 + $0x20] sm:$0xff] (!%p283_p3)   ;;  %v1293_v8 = vld [vmem:[%s1606_s2 + $0x28] sm:$0xff] (!%p283_p3)  }
   0x8   : > { %1216 = vmatpush3.bf16.msra.mxu0 (!%p283_p3), %v1288_v0  ;;  %1240 = vmatpush3.bf16.msra.mxu1 (!%p283_p3), %v1288_v0  ;;  %v1294_v9 = vld [vmem:[%s1606_s2 + $0x30] sm:$0xff] (!%p283_p3)   ;;  %v1295_v10 = vld [vmem:[%s1606_s2 + $0x38] sm:$0xff] (!%p283_p3)   ;;  %v1089_v17 = vld [vmem:[%s1607_s3] ss:$0 sm:$0xff] (!%p283_p3) }
   0x9   : > { %1217 = vmatprep.subr.bf16.mxu0 (!%p283_p3), %v1289_v1  ;;  %1241 = vmatprep.subr.bf16.mxu1 (!%p283_p3), %v1289_v1 }
   0xc   : > { %1218 = vmatpush3.bf16.msra.mxu0 (!%p283_p3), %v1289_v1  ;;  %1242 = vmatpush3.bf16.msra.mxu1 (!%p283_p3), %v1289_v1 }
   0xd   : > { %1219 = vmatprep.subr.bf16.mxu0 (!%p283_p3), %v1290_v2  ;;  %1243 = vmatprep.subr.bf16.mxu1 (!%p283_p3), %v1290_v2 }
   0xe   : > { %s1617_s24 = smov (!%p344_p4, %s1350_s24), 1 }
   0xf   : > { %s1428_s11 = sshll.u32 %s1617_s24, 5  ;;  %s1433_s14 = scalar_lea.vmem %s1611_s7, %s1617_s24 }
  0x10   : > { %s1439_s17 = scalar_lea.vmem %s1604_s0, %s1428_s11  ;;  %892 = vst [vmem:[%s1433_s14] sm:$0x1] %v1360_v3  ;;  %s1446_s20 = scalar_lea.vmem %s1605_s1, %s1428_s11  ;;  %1220 = vmatpush3.bf16.msra.mxu0 %v1290_v2  ;;  %1244 = vmatpush3.bf16.msra.mxu1 %v1290_v2 }
  0x11   : > { %v1296_v5 = vld [vmem:[%s1439_s17] sm:$0xff]   ;;  %1221 = vmatprep.subr.bf16.mxu0 %v1291_v4  ;;  %1245 = vmatprep.subr.bf16.mxu1 %v1291_v4  ;;  %v1298_v11 = vld [vmem:[%s1439_s17 + $0x8] sm:$0xff]   ;;  %v1300_v13 = vld [vmem:[%s1439_s17 + $0x10] sm:$0xff]  }
  0x12   : > { %v1297_v6 = vld [vmem:[%s1446_s20] sm:$0xff]   ;;  %1231 = vmatprep.mubr.bf16.mxu0 %v1296_v5  ;;  %v1299_v12 = vld [vmem:[%s1446_s20 + $0x8] sm:$0xff]   ;;  %v1301_v14 = vld [vmem:[%s1446_s20 + $0x10] sm:$0xff]  }
  0x13   : > { %1255 = vmatprep.mubr.bf16.mxu1 %v1297_v6  ;;  %v1302_v15 = vld [vmem:[%s1439_s17 + $0x18] sm:$0xff]   ;;  %s1494_s17 = scalar_lea.vmem %s1609_s5, %s1428_s11 }
  0x14   : > { %1222 = vmatpush3.bf16.msra.mxu0 %v1291_v4  ;;  %1246 = vmatpush3.bf16.msra.mxu1 %v1291_v4  ;;  %v1303_v16 = vld [vmem:[%s1446_s20 + $0x18] sm:$0xff]   ;;  %s1500_s20 = scalar_lea.vmem %s1610_s6, %s1428_s11 }
  0x15   : > { %1223 = vmatprep.subr.bf16.mxu0 %v1292_v7  ;;  %1247 = vmatprep.subr.bf16.mxu1 %v1292_v7 }
  0x18   : > { %1224 = vmatpush3.bf16.msra.mxu0 %v1292_v7  ;;  %1248 = vmatpush3.bf16.msra.mxu1 %v1292_v7 }
  0x19   : > { %1225 = vmatprep.subr.bf16.mxu0 %v1293_v8  ;;  %1249 = vmatprep.subr.bf16.mxu1 %v1293_v8 }
  0x1c   : > { %1226 = vmatpush3.bf16.msra.mxu0 %v1293_v8  ;;  %1250 = vmatpush3.bf16.msra.mxu1 %v1293_v8 }
  0x1d   : > { %1227 = vmatprep.subr.bf16.mxu0 %v1294_v9  ;;  %1251 = vmatprep.subr.bf16.mxu1 %v1294_v9 }
  0x20   : > { %1228 = vmatpush3.bf16.msra.mxu0 %v1294_v9  ;;  %1252 = vmatpush3.bf16.msra.mxu1 %v1294_v9 }
  0x21   : > { %1229 = vmatprep.subr.bf16.mxu0 %v1295_v10  ;;  %1253 = vmatprep.subr.bf16.mxu1 %v1295_v10 }
  0x24   : > { %1230 = vmatpush3.bf16.msra.mxu0 %v1295_v10  ;;  %1254 = vmatpush3.bf16.msra.mxu1 %v1295_v10 }
  0x27   : > { %1232 = vmatmul.mubr.bf16.vlgmr.msra.gmra.mrb[0].mxu0 %v1298_v11  ;;  %1256 = vmatmul.mubr.bf16.vlgmr.msra.gmra.mrb[0].mxu1 %v1299_v12 }
  0x28   : > { %1235 = vmatprep.mubr.bf16.mxu0 %v1300_v13  ;;  %1259 = vmatprep.mubr.bf16.mxu1 %v1301_v14 }
  0x2f   : > { %1236 = vmatmul.mubr.bf16.gmra.mrb[4].mxu0 %v1302_v15  ;;  %1260 = vmatmul.mubr.bf16.gmra.mrb[4].mxu1 %v1303_v16 }
  0xfa   : > { %v1233_v18 = vpop.f32.mrb[0].mxu0  ;;  %v1257_v19 = vpop.f32.mrb[0].mxu1 }
  0xfb   : > { %v534_v20 = vadd.f32 %v1233_v18, %v1089_v17  ;;  %v639_v21 = vadd.f32 %v1257_v19, %v1089_v17  ;;  %v525_v22 = vpop.f32.mrb[1].mxu0  ;;  %v630_v23 = vpop.f32.mrb[1].mxu1 }
  0xfc   : > { %v526_v24 = vadd.f32 %v1089_v17, %v525_v22  ;;  %v631_v25 = vadd.f32 %v1089_v17, %v630_v23  ;;  %v1234_v26 = vpop.f32.mrb[2].mxu0  ;;  %v1258_v27 = vpop.f32.mrb[2].mxu1 }
  0xfd   : > { %v1474_v28 = vmax.f32 %v534_v20, 0.0  ;;  %v1476_v29 = vmax.f32 %v639_v21, 0.0  ;;  %v537_v30 = vadd.f32 %v1234_v26, %v1089_v17  ;;  %v642_v31 = vadd.f32 %v1258_v27, %v1089_v17  ;;  %v528_v32 = vpop.f32.mrb[3].mxu0  ;;  %v633_v33 = vpop.f32.mrb[3].mxu1 }
  0xfe   : > { %v1478_v34 = vmax.f32 %v526_v24, 0.0  ;;  %v1480_v35 = vmax.f32 %v631_v25, 0.0  ;;  %v529_v36 = vadd.f32 %v1089_v17, %v528_v32  ;;  %v634_v37 = vadd.f32 %v1089_v17, %v633_v33 }
  0xff   : > { %v1482_v38 = vmax.f32 %v537_v30, 0.0  ;;  %v1484_v39 = vmax.f32 %v642_v31, 0.0  ;;  %v799_v40 = vmul.f32 %v1476_v29, %v1476_v29  ;;  %v751_v41 = vmul.f32 %v1474_v28, %v1474_v28 }
 0x100   : > { %v1502_v42 = vmax.f32 %v529_v36, 0.0  ;;  %v1504_v43 = vmax.f32 %v634_v37, 0.0  ;;  %v797_v50 = vmul.f32 %v1480_v35, %v1480_v35  ;;  %v749_v51 = vmul.f32 %v1478_v34, %v1478_v34 }
 0x101   : > { %v1153_v44 = vpack.c.bf16 %v1482_v38, %v1474_v28  ;;  %v1173_v45 = vpack.c.bf16 %v1484_v39, %v1476_v29  ;;  %809 = vadd.xlane.f32.xlu1 %v799_v40  ;;  %761 = vadd.xlane.f32.xlu0 %v751_v41  ;;  %v800_v7 = vmul.f32 %v1484_v39, %v1484_v39 }
 0x102   : > { %v1148_v46 = vpack.c.bf16 %v1502_v42, %v1478_v34  ;;  %v1168_v47 = vpack.c.bf16 %v1504_v43, %v1480_v35  ;;  %v1237_v48 = vpop.f32.mrb[4].mxu0  ;;  %v1261_v49 = vpop.f32.mrb[4].mxu1  ;;  %v752_v9 = vmul.f32 %v1482_v38, %v1482_v38  ;;  %v798_v16 = vmul.f32 %v1504_v43, %v1504_v43 }
 0x103   : > { %1185 = vst [vmem:[%s1494_s17 + $0x8] sm:$0xff] %v1153_v44   ;;  %1188 = vst [vmem:[%s1500_s20 + $0x8] sm:$0xff] %v1173_v45   ;;  %v550_v52 = vadd.f32 %v1237_v48, %v1089_v17  ;;  %v655_v53 = vadd.f32 %v1261_v49, %v1089_v17  ;;  %v541_v54 = vpop.f32.mrb[5].mxu0  ;;  %v646_v55 = vpop.f32.mrb[5].mxu1 }
 0x104   : > { %1149 = vst [vmem:[%s1494_s17] sm:$0xff] %v1148_v46   ;;  %1169 = vst [vmem:[%s1500_s20] sm:$0xff] %v1168_v47   ;;  %v542_v56 = vadd.f32 %v1089_v17, %v541_v54  ;;  %v647_v57 = vadd.f32 %v1089_v17, %v646_v55  ;;  %v1262_v58 = vpop.f32.mrb[6].mxu1  ;;  %v1238_v59 = vpop.f32.mrb[6].mxu0 }
 0x105   : > { %805 = vadd.xlane.f32.xlu1 %v797_v50  ;;  %757 = vadd.xlane.f32.xlu0 %v749_v51  ;;  %v1522_v60 = vmax.f32 %v550_v52, 0.0  ;;  %v1524_v61 = vmax.f32 %v655_v53, 0.0  ;;  %v658_v62 = vadd.f32 %v1262_v58, %v1089_v17  ;;  %v553_v63 = vadd.f32 %v1238_v59, %v1089_v17  ;;  %v544_v0 = vpop.f32.mrb[7].mxu0  ;;  %v649_v1 = vpop.f32.mrb[7].mxu1 }
 0x106   : > { %v1526_v2 = vmax.f32 %v542_v56, 0.0  ;;  %v1528_v3 = vmax.f32 %v647_v57, 0.0  ;;  %v545_v4 = vadd.f32 %v1089_v17, %v544_v0  ;;  %v650_v5 = vadd.f32 %v1089_v17, %v649_v1 }
 0x107   : > { %v1530_v6 = vmax.f32 %v658_v62, 0.0  ;;  %v1534_v8 = vmax.f32 %v553_v63, 0.0  ;;  %v750_v17 = vmul.f32 %v1502_v42, %v1502_v42  ;;  %v803_v18 = vmul.f32 %v1524_v61, %v1524_v61 }
 0x108   : > { %v1538_v10 = vmax.f32 %v545_v4, 0.0  ;;  %v1540_v11 = vmax.f32 %v650_v5, 0.0  ;;  %v755_v19 = vmul.f32 %v1522_v60, %v1522_v60  ;;  %v801_v20 = vmul.f32 %v1528_v3, %v1528_v3 }
 0x109   : > { %v1183_v12 = vpack.c.bf16 %v1530_v6, %v1524_v61  ;;  %811 = vadd.xlane.f32.xlu1 %v800_v7  ;;  %v1163_v13 = vpack.c.bf16 %v1534_v8, %v1522_v60  ;;  %763 = vadd.xlane.f32.xlu0 %v752_v9  ;;  %v753_v21 = vmul.f32 %v1526_v2, %v1526_v2 }
 0x10a   : > { %v1158_v14 = vpack.c.bf16 %v1538_v10, %v1526_v2  ;;  %v1178_v15 = vpack.c.bf16 %v1540_v11, %v1528_v3  ;;  %v802_v22 = vmul.f32 %v1540_v11, %v1540_v11  ;;  %v754_v23 = vmul.f32 %v1538_v10, %v1538_v10 }
 0x10b   : > { %1190 = vst [vmem:[%s1500_s20 + $0x18] sm:$0xff] %v1183_v12   ;;  %1187 = vst [vmem:[%s1494_s17 + $0x18] sm:$0xff] %v1163_v13   ;;  %v804_v24 = vmul.f32 %v1530_v6, %v1530_v6  ;;  %v756_v25 = vmul.f32 %v1534_v8, %v1534_v8 }
 0x10c   : > { %1186 = vst [vmem:[%s1494_s17 + $0x10] sm:$0xff] %v1158_v14   ;;  %1189 = vst [vmem:[%s1500_s20 + $0x10] sm:$0xff] %v1178_v15  }
 0x10d   : > { %807 = vadd.xlane.f32.xlu1 %v798_v16  ;;  %759 = vadd.xlane.f32.xlu0 %v750_v17 }
 0x111   : > { %817 = vadd.xlane.f32.xlu1 %v803_v18  ;;  %769 = vadd.xlane.f32.xlu0 %v755_v19 }
 0x115   : > { %813 = vadd.xlane.f32.xlu1 %v801_v20  ;;  %765 = vadd.xlane.f32.xlu0 %v753_v21 }
 0x119   : > { %815 = vadd.xlane.f32.xlu1 %v802_v22  ;;  %767 = vadd.xlane.f32.xlu0 %v754_v23 }
 0x11d   : > { %819 = vadd.xlane.f32.xlu1 %v804_v24  ;;  %771 = vadd.xlane.f32.xlu0 %v756_v25 }
 0x18e   : > { %v810_v26 = vpop.xlane.xlu1 %809  ;;  %v762_v27 = vpop.xlane.xlu0 %761 }
 0x18f   : > { %v823_v36 = vadd.f32 1e-20, %v810_v26  ;;  %v775_v37 = vadd.f32 1e-20, %v762_v27 }
 0x192   : > { %v806_v30 = vpop.xlane.xlu1 %805  ;;  %v758_v31 = vpop.xlane.xlu0 %757 }
 0x193   : > { %v821_v32 = vadd.f32 1e-20, %v806_v30  ;;  %v773_v33 = vadd.f32 1e-20, %v758_v31 }
 0x195   : > { %1304 = vrsqrt.f32 %v821_v32 }
 0x196   : > { %1306 = vrsqrt.f32 %v773_v33  ;;  %v812_v40 = vpop.xlane.xlu1 %811  ;;  %v764_v41 = vpop.xlane.xlu0 %763 }
 0x197   : > { %v824_v44 = vadd.f32 1e-20, %v812_v40  ;;  %1308 = vrsqrt.f32 %v823_v36  ;;  %v776_v45 = vadd.f32 1e-20, %v764_v41 }
 0x198   : > { %1310 = vrsqrt.f32 %v775_v37 }
 0x199   : > { %1312 = vrsqrt.f32 %v824_v44 }
 0x19a   : > { %v808_v46 = vpop.xlane.xlu1 %807  ;;  %v760_v47 = vpop.xlane.xlu0 %759  ;;  %1314 = vrsqrt.f32 %v776_v45 }
 0x19b   : > { %v822_v48 = vadd.f32 1e-20, %v808_v46  ;;  %v774_v49 = vadd.f32 1e-20, %v760_v47 }
 0x19d   : > { %1316 = vrsqrt.f32 %v822_v48 }
 0x19e   : > { %1318 = vrsqrt.f32 %v774_v49  ;;  %v818_v50 = vpop.xlane.xlu1 %817  ;;  %v770_v51 = vpop.xlane.xlu0 %769 }
 0x19f   : > { %v1305_v52 = vpop.eup %1304  ;;  %v827_v53 = vadd.f32 1e-20, %v818_v50  ;;  %v779_v55 = vadd.f32 1e-20, %v770_v51 }
 0x1a0   : > { %v1307_v54 = vpop.eup %1306  ;;  %v837_v57 = vmul.f32 %v1305_v52, %v1480_v35 }
 0x1a1   : > { %v1309_v56 = vpop.eup %1308  ;;  %v789_v58 = vmul.f32 %v1307_v54, %v1478_v34  ;;  %1320 = vrsqrt.f32 %v827_v53 }
 0x1a2   : > { %v814_v59 = vpop.xlane.xlu1 %813  ;;  %v766_v62 = vpop.xlane.xlu0 %765  ;;  %1322 = vrsqrt.f32 %v779_v55  ;;  %v839_v7 = vmul.f32 %v1309_v56, %v1476_v29 }
 0x1a3   : > { %v1311_v63 = vpop.eup %1310  ;;  %v825_v0 = vadd.f32 1e-20, %v814_v59  ;;  %v777_v1 = vadd.f32 1e-20, %v766_v62  ;;  %v845_v12 = vsub.f32 %v789_v58, %v837_v57 }
 0x1a4   : > { %v1313_v4 = vpop.eup %1312  ;;  %v791_v9 = vmul.f32 %v1311_v63, %v1474_v28 }
 0x1a5   : > { %1324 = vrsqrt.f32 %v825_v0  ;;  %v1315_v5 = vpop.eup %1314  ;;  %v853_v20 = vmul.f32 %v845_v12, %v845_v12  ;;  %v840_v21 = vmul.f32 %v1313_v4, %v1484_v39 }
 0x1a6   : > { %1326 = vrsqrt.f32 %v777_v1  ;;  %v816_v13 = vpop.xlane.xlu1 %815  ;;  %v768_v35 = vpop.xlane.xlu0 %767  ;;  %v847_v19 = vsub.f32 %v791_v9, %v839_v7  ;;  %v792_v22 = vmul.f32 %v1315_v5, %v1482_v38 }
 0x1a7   : > { %v1317_v14 = vpop.eup %1316  ;;  %v826_v34 = vadd.f32 1e-20, %v816_v13  ;;  %v778_v15 = vadd.f32 1e-20, %v768_v35 }
 0x1a8   : > { %v1319_v16 = vpop.eup %1318  ;;  %v838_v17 = vmul.f32 %v1317_v14, %v1504_v43  ;;  %v855_v31 = vmul.f32 %v847_v19, %v847_v19  ;;  %v848_v32 = vsub.f32 %v792_v22, %v840_v21 }
 0x1a9   : > { %v790_v18 = vmul.f32 %v1319_v16, %v1502_v42  ;;  %1328 = vrsqrt.f32 %v826_v34  ;;  %v1122_v42 = vld [vmem:[%s1608_s4] ss:$0 sm:$0xff] }
 0x1aa   : > { %1330 = vrsqrt.f32 %v778_v15  ;;  %v820_v29 = vpop.xlane.xlu1 %819  ;;  %v772_v28 = vpop.xlane.xlu0 %771  ;;  %v867_v39 = vmul.f32 %v1122_v42, %v853_v20  ;;  %v869_v46 = vmul.f32 %v1122_v42, %v855_v31  ;;  %v856_v47 = vmul.f32 %v848_v32, %v848_v32  ;;  %v893_v34 = vld [vmem:[%s1433_s14] sm:$0x1] }
 0x1ab   : > { %v846_v23 = vsub.f32 %v790_v18, %v838_v17  ;;  %v828_v24 = vadd.f32 1e-20, %v820_v29  ;;  %v780_v25 = vadd.f32 1e-20, %v772_v28  ;;  %v1321_v26 = vpop.eup %1320 }
 0x1ac   : > { %v1323_v30 = vpop.eup %1322  ;;  %v843_v40 = vmul.f32 %v1321_v26, %v1524_v61  ;;  %v870_v55 = vmul.f32 %v1122_v42, %v856_v47 }
 0x1ad   : > { %v854_v27 = vmul.f32 %v846_v23, %v846_v23  ;;  %1332 = vrsqrt.f32 %v828_v24  ;;  %v795_v41 = vmul.f32 %v1323_v30, %v1522_v60 }
 0x1ae   : > { %1334 = vrsqrt.f32 %v780_v25 }
 0x1af   : > { %v1325_v43 = vpop.eup %1324  ;;  %v868_v33 = vmul.f32 %v1122_v42, %v854_v27  ;;  %v851_v52 = vsub.f32 %v795_v41, %v843_v40 }
 0x1b0   : > { %v1327_v36 = vpop.eup %1326  ;;  %v841_v38 = vmul.f32 %v1325_v43, %v1528_v3 }
 0x1b1   : > { %v875_v37 = vadd.f32 %v868_v33, %v867_v39  ;;  %v793_v44 = vmul.f32 %v1327_v36, %v1526_v2  ;;  %v859_v2 = vmul.f32 %v851_v52, %v851_v52 }
 0x1b3   : > { %v1329_v45 = vpop.eup %1328  ;;  %v849_v48 = vsub.f32 %v793_v44, %v841_v38  ;;  %v876_v51 = vadd.f32 %v875_v37, %v869_v46  ;;  %v873_v1 = vmul.f32 %v1122_v42, %v859_v2 }
 0x1b4   : > { %v1331_v49 = vpop.eup %1330  ;;  %v842_v50 = vmul.f32 %v1329_v45, %v1540_v11 }
 0x1b5   : > { %v857_v53 = vmul.f32 %v849_v48, %v849_v48  ;;  %v794_v54 = vmul.f32 %v1331_v49, %v1538_v10  ;;  %v877_v58 = vadd.f32 %v876_v51, %v870_v55 }
 0x1b7   : > { %v1333_v3 = vpop.eup %1332  ;;  %v871_v56 = vmul.f32 %v1122_v42, %v857_v53  ;;  %v850_v61 = vsub.f32 %v794_v54, %v842_v50 }
 0x1b8   : > { %v1335_v57 = vpop.eup %1334  ;;  %v844_v60 = vmul.f32 %v1333_v3, %v1530_v6 }
 0x1b9   : > { %v858_v59 = vmul.f32 %v850_v61, %v850_v61  ;;  %v796_v62 = vmul.f32 %v1335_v57, %v1534_v8  ;;  %v878_v63 = vadd.f32 %v877_v58, %v871_v56 }
 0x1bb   : > { %v872_v11 = vmul.f32 %v1122_v42, %v858_v59  ;;  %v852_v0 = vsub.f32 %v796_v62, %v844_v60 }
 0x1bd   : > { %v879_v4 = vadd.f32 %v878_v63, %v872_v11  ;;  %v860_v10 = vmul.f32 %v852_v0, %v852_v0 }
 0x1bf   : > { %v880_v5 = vadd.f32 %v879_v4, %v873_v1  ;;  %v874_v7 = vmul.f32 %v1122_v42, %v860_v10 }
 0x1c1   : > { %v881_v9 = vadd.f32 %v880_v5, %v874_v7 }
 0x1c3   : > { %v882_v12 = vrot.slane %v881_v9, 4 }
 0x1c5   : > { %v883_v13 = vadd.f32 %v882_v12, %v881_v9 }
 0x1c7   : > { %v884_v35 = vrot.slane %v883_v13, 2 }
 0x1c9   : > { %v885_v6 = vadd.f32 %v884_v35, %v883_v13 }
 0x1cb   : > { %v886_v14 = vrot.slane %v885_v6, 1 }
 0x1cd   : > { %v887_v15 = vadd.f32 %v886_v14, %v885_v6 }
 0x1cf   : > { %v894_v16 = vadd.f32 %v893_v34, %v887_v15 }
 0x1d1   : > { %895 = vst [vmem:[%s1433_s14] sm:$0x1] %v894_v16 }
 0x1d2 PF: > { %s18_s26 = sadd.s32 1, %s1358_s26   ;;  %s1612_s24 = smov %s1354_s25 }
 0x1d3   : > { %p15_p5 = scmp.ge.s32.totalorder %s18_s26, 4   ;;  %s1613_s25 = smov %s1615_s27 }
 0x1d5   :  { %17 = sbr.rel (!%p15_p5) target bundleno = 2 (0x2), region = 101 }

// kernel: lpips_forward.9
= control target key start
LH: loop header
LB: loop body
LE: loop exit
PB: predicated region body
PF: predicated region fallthrough
CT: control target
= control target key end

     0   :  { %s3221_s0 = inlined_call_operand.vmem [shape: bf16[2,16,1152], index: 0, kind: input, shape index: {}]   ;;  %s3222_s1 = inlined_call_operand.vmem [shape: bf16[2,16,1152], index: 1, kind: input, shape index: {}]   ;;  %s3223_s2 = inlined_call_operand.vmem [shape: bf16[1152,128], index: 2, kind: input, shape index: {}]   ;;  %s3224_s3 = inlined_call_operand.vmem [shape: f32[1,128], index: 3, kind: input, shape index: {}]   ;;  %s3225_s4 = inlined_call_operand.vmem [shape: f32[1,128], index: 4, kind: input, shape index: {}]   ;;  %s3226_s5 = inlined_call_operand.hbm [shape: bf16[2,16,128], index: 5, kind: output, shape index: {0}]   ;;  %s3227_s6 = inlined_call_operand.hbm [shape: bf16[2,16,128], index: 6, kind: output, shape index: {1}]   ;;  %s3228_s7 = inlined_call_operand.vmem [shape: f32[2,1,128], index: 7, kind: output, shape index: {2}]  }
   0x1   :  { %3236 = sst [smem:[#allocation14_spill]] %s3221_s0 }
   0x2   :  { %3237 = sst [smem:[#allocation15_spill]] %s3222_s1 }
   0x3   :  { %3238 = sst [smem:[#allocation16_spill]] %s3223_s2 }
   0x4   :  { %13 = vsyncpa [#allocation3], 0 }
   0x5   :  { %15 = vsyncpa [#allocation3 + $0x1], 0 }
   0x6   :  { %16 = vsyncpa [#allocation5], 0 }
   0x7   :  { %18 = vsyncpa [#allocation5 + $0x1], 0  ;;  %s2448_s24 = smov 0   ;;  %s2450_s25 = smov 0  }
   0x8   :  { %s2452_s26 = smov 0   ;;  %s2454_s27 = smov 0  }
   0x9   :  { %s2456_s28 = smov 0   ;;  %s2458_s29 = smov 0  }
   0xa LB: > { %s1756_s30 = sadd.s32 4294967295, %s2400_s29   ;;  %s1757_s8 = sadd.s32 4294967294, %s2400_s29   ;;  %s2400_s29 = sphi %s2458_s29, %s24_s29   ;;  %s2396_s28 = sphi %s2456_s28, %s3262_s28   ;;  %s2392_s27 = sphi %s2454_s27, %s3261_s27   ;;  %s2388_s26 = sphi %s2452_s26, %s3260_s26   ;;  %s2384_s25 = sphi %s2450_s25, %s3259_s25   ;;  %s2380_s24 = sphi %s2448_s24, %s3258_s24  }
   0xb   : > { %s36_s9 = sadd.s32 1, %s2396_s28  ;;  %s164_s10 = sadd.s32 1, %s2388_s26 }
   0xc   : > { %p38_p0 = scmp.ge.s32.totalorder %s36_s9, 2  ;;  %p174_p1 = scmp.ne.s32.totalorder %s2388_s26, %s2384_s25 }
   0xd   : > { %p175_p2 = scmp.eq.s32.totalorder %s1756_s30, 1  ;;  %p180_p3 = scmp.ne.s32.totalorder %s2384_s25, %s2380_s24 }
   0xe   : > { %s3264_s9 = smov (%p38_p0, %s36_s9), 0  ;;  %p181_p5 = scmp.eq.s32.totalorder %s1757_s8, 1 }
   0xf   : > { %p2488_p4 = por %p175_p2, %p174_p1  ;;  %s159_s12 = ssub.s32 %s2396_s28, %s3264_s9 }
  0x10   : > { %p1760_p6 = scmp.ge.s32.totalorder %s2400_s29, 1  ;;  %p162_p7 = scmp.eq.s32.totalorder %s159_s12, 0 }
  0x11   : > { %p2495_p8 = por %p181_p5, %p180_p3  ;;  %p290_p9 = scmp.lt.s32.totalorder %s2400_s29, 3 }
  0x12   : > { %s2501_s14 = scalar_select %p162_p7, %s2388_s26, %s164_s10  }
  0x13   : > { %p291_p10 = pnand %p1760_p6, %p290_p9 }
  0x15   : > { %294 = sbr.rel (%p291_p10) target bundleno = 602 (0x25a), region = 40 }
  0x1c   : > { %s3241_s2 = sld [smem:[#allocation16_spill]]  ;;  %p346_p11 = scmp.lt.s32.totalorder %s2392_s27, 1  ;;  %vm2403_vm0 = vmmov 0  }
  0x1d   : > { %s3242_s0 = sld [smem:[#allocation14_spill]]  ;;  %s3249_s1 = sld [smem:[#allocation15_spill]] }
  0x1e   : > { %s2629_s18 = scalar_select %p346_p11, %s2392_s27, 1 }
  0x1f   : > { %s3235_s21 = sshll.u32 %s2392_s27, 7 }
  0x20   : > { %s2119_s12 = smul.u32 72, %s2629_s18  ;;  %s3111_s20 = scalar_lea.vmem %s3228_s7, %s2629_s18 }
  0x21   : > { %s3122_s8 = scalar_lea.hbm %s3226_s5, %s3235_s21  ;;  %s2404_s18 = smov [#allocation2]  }
  0x22   : > { %v2506_v0 = vld [vmem:[%s3241_s2 + $0x40] sm:$0xff]   ;;  %v2529_v4 = vld [vmem:[%s3241_s2 + $0x48] sm:$0xff]   ;;  %v2553_v8 = vld [vmem:[%s3241_s2 + $0x50] sm:$0xff]   ;;  %s2294_s19 = sshll.u32 %s2404_s18, 4  ;;  %s2295_s19 = int_to_ptr.vmem [resolvable:$false] %s2294_s19 }
  0x23   : > { %v2511_v1 = vld [vmem:[%s3241_s2] sm:$0xff]   ;;  %1885 = vmatprep.subr.bf16.mxu0 %v2506_v0  ;;  %v2535_v5 = vld [vmem:[%s3241_s2 + $0x8] sm:$0xff]   ;;  %v2559_v9 = vld [vmem:[%s3241_s2 + $0x10] sm:$0xff]   ;;  %s2685_s10 = scalar_lea.vmem %s3242_s0, %s2119_s12  ;;  %s2936_s30 = scalar_lea.vmem %s3249_s1, %s2119_s12 }
  0x24   : > { %v2517_v2 = vld [vmem:[%s3241_s2 + $0xc0] sm:$0xff]   ;;  %1886 = vmatpush3.bf16.msra.mxu0 %v2511_v1  ;;  %v2541_v6 = vld [vmem:[%s3241_s2 + $0xc8] sm:$0xff]   ;;  %v2565_v10 = vld [vmem:[%s3241_s2 + $0xd0] sm:$0xff]  }
  0x25   : > { %v2523_v3 = vld [vmem:[%s3241_s2 + $0x80] sm:$0xff]   ;;  %1907 = vmatprep.subr.bf16.mxu1 %v2517_v2  ;;  %1887 = vmatprep.subr.bf16.mxu0 %v2529_v4  ;;  %v2547_v7 = vld [vmem:[%s3241_s2 + $0x88] sm:$0xff]   ;;  %v2571_v11 = vld [vmem:[%s3241_s2 + $0x90] sm:$0xff]  }
  0x26   : > { %1908 = vmatpush3.bf16.msra.mxu1 %v2523_v3  ;;  %v2577_v12 = vld [vmem:[%s3241_s2 + $0x58] sm:$0xff]   ;;  %v2601_v16 = vld [vmem:[%s3241_s2 + $0x60] sm:$0xff]   ;;  %v2626_v20 = vld [vmem:[%s3241_s2 + $0x68] sm:$0xff]  }
  0x27   : > { %1909 = vmatprep.subr.bf16.mxu1 %v2541_v6  ;;  %v2583_v13 = vld [vmem:[%s3241_s2 + $0x18] sm:$0xff]   ;;  %v2608_v17 = vld [vmem:[%s3241_s2 + $0x20] sm:$0xff]   ;;  %v2635_v21 = vld [vmem:[%s3241_s2 + $0x28] sm:$0xff]  }
  0x28   : > { %1888 = vmatpush3.bf16.msra.mxu0 %v2535_v5  ;;  %v2589_v14 = vld [vmem:[%s3241_s2 + $0xd8] sm:$0xff]   ;;  %v2614_v18 = vld [vmem:[%s3241_s2 + $0xe0] sm:$0xff]   ;;  %v2641_v22 = vld [vmem:[%s3241_s2 + $0xe8] sm:$0xff]  }
  0x29   : > { %1889 = vmatprep.subr.bf16.mxu0 %v2553_v8  ;;  %v2595_v15 = vld [vmem:[%s3241_s2 + $0x98] sm:$0xff]   ;;  %v2620_v19 = vld [vmem:[%s3241_s2 + $0xa0] sm:$0xff]   ;;  %v2647_v23 = vld [vmem:[%s3241_s2 + $0xa8] sm:$0xff]  }
  0x2a   : > { %1910 = vmatpush3.bf16.msra.mxu1 %v2547_v7  ;;  %v2653_v24 = vld [vmem:[%s3241_s2 + $0x70] sm:$0xff]   ;;  %v2678_v28 = vld [vmem:[%s3241_s2 + $0x78] sm:$0xff]   ;;  %v2215_v31 = vld [vmem:[%s2685_s10] ss:$36 sps:$4 sm:$0xff]  }
  0x2b   : > { %1911 = vmatprep.subr.bf16.mxu1 %v2565_v10  ;;  %v2660_v25 = vld [vmem:[%s3241_s2 + $0x30] sm:$0xff]   ;;  %v2691_v29 = vld [vmem:[%s3241_s2 + $0x38] sm:$0xff]   ;;  %v2217_v32 = vld [vmem:[%s2685_s10 + $0x4] ss:$36 sps:$4 sm:$0xff]  }
  0x2c   : > { %1890 = vmatpush3.bf16.msra.mxu0 %v2559_v9  ;;  %v2666_v26 = vld [vmem:[%s3241_s2 + $0xf0] sm:$0xff]   ;;  %v2697_v30 = vld [vmem:[%s3241_s2 + $0xf8] sm:$0xff]   ;;  %1045 = vmatprep.mubr.bf16.mxu0 %v2217_v32  ;;  %v2711_v34 = vld [vmem:[%s3241_s2 + $0x140] sm:$0xff]  }
  0x2d   : > { %1891 = vmatprep.subr.bf16.mxu0 %v2577_v12  ;;  %v2672_v27 = vld [vmem:[%s3241_s2 + $0xb0] sm:$0xff]   ;;  %v2706_v33 = vld [vmem:[%s3241_s2 + $0xb8] sm:$0xff]   ;;  %v2220_v35 = vld [vmem:[%s2685_s10 + $0x8] ss:$36 sps:$4 sm:$0xff]  }
  0x2e   : > { %1912 = vmatpush3.bf16.msra.mxu1 %v2571_v11  ;;  %v2222_v36 = vld [vmem:[%s2685_s10 + $0xc] ss:$36 sps:$4 sm:$0xff]   ;;  %v2720_v37 = vld [vmem:[%s3241_s2 + $0x100] sm:$0xff]   ;;  %v2785_v48 = vld [vmem:[%s3241_s2 + $0x158] sm:$0xff]  }
  0x2f   : > { %1913 = vmatprep.subr.bf16.mxu1 %v2589_v14  ;;  %1086 = vmatprep.mubr.bf16.mxu1 %v2222_v36  ;;  %v2725_v38 = vld [vmem:[%s3241_s2 + $0x1c0] sm:$0xff]   ;;  %v2737_v40 = vld [vmem:[%s3241_s2 + $0x148] sm:$0xff]   ;;  %v2761_v44 = vld [vmem:[%s3241_s2 + $0x150] sm:$0xff]  }
  0x30   : > { %1892 = vmatpush3.bf16.msra.mxu0 %v2583_v13  ;;  %v2731_v39 = vld [vmem:[%s3241_s2 + $0x180] sm:$0xff]   ;;  %v2743_v41 = vld [vmem:[%s3241_s2 + $0x108] sm:$0xff]   ;;  %v2767_v45 = vld [vmem:[%s3241_s2 + $0x110] sm:$0xff]  }
  0x31   : > { %1893 = vmatprep.subr.bf16.mxu0 %v2601_v16  ;;  %v2749_v42 = vld [vmem:[%s3241_s2 + $0x1c8] sm:$0xff]   ;;  %v2773_v46 = vld [vmem:[%s3241_s2 + $0x1d0] sm:$0xff]   ;;  %v2791_v49 = vld [vmem:[%s3241_s2 + $0x118] sm:$0xff]  }
  0x32   : > { %1914 = vmatpush3.bf16.msra.mxu1 %v2595_v15  ;;  %v2755_v43 = vld [vmem:[%s3241_s2 + $0x188] sm:$0xff]   ;;  %v2779_v47 = vld [vmem:[%s3241_s2 + $0x190] sm:$0xff]   ;;  %v2797_v50 = vld [vmem:[%s3241_s2 + $0x1d8] sm:$0xff]  }
  0x33   : > { %1915 = vmatprep.subr.bf16.mxu1 %v2614_v18  ;;  %v2803_v51 = vld [vmem:[%s3241_s2 + $0x198] sm:$0xff]   ;;  %v2809_v52 = vld [vmem:[%s3241_s2 + $0x160] sm:$0xff]   ;;  %v2833_v56 = vld [vmem:[%s3241_s2 + $0x168] sm:$0xff]  }
  0x34   : > { %1894 = vmatpush3.bf16.msra.mxu0 %v2608_v17  ;;  %v2815_v53 = vld [vmem:[%s3241_s2 + $0x120] sm:$0xff]   ;;  %v2839_v57 = vld [vmem:[%s3241_s2 + $0x128] sm:$0xff]   ;;  %v2857_v60 = vld [vmem:[%s3241_s2 + $0x170] sm:$0xff]  }
  0x35   : > { %1895 = vmatprep.subr.bf16.mxu0 %v2626_v20  ;;  %v2821_v54 = vld [vmem:[%s3241_s2 + $0x1e0] sm:$0xff]   ;;  %v2845_v58 = vld [vmem:[%s3241_s2 + $0x1e8] sm:$0xff]   ;;  %v2863_v61 = vld [vmem:[%s3241_s2 + $0x130] sm:$0xff]  }
  0x36   : > { %1916 = vmatpush3.bf16.msra.mxu1 %v2620_v19  ;;  %3243 = vst [vmem:[#allocation8_spill] sm:$0xff] %v2821_v54  ;;  %v2827_v55 = vld [vmem:[%s3241_s2 + $0x1a0] sm:$0xff]   ;;  %3245 = vst [vmem:[#allocation10_spill] sm:$0xff] %v2845_v58  ;;  %v2851_v59 = vld [vmem:[%s3241_s2 + $0x1a8] sm:$0xff]  }
  0x37   : > { %1917 = vmatprep.subr.bf16.mxu1 %v2641_v22  ;;  %3244 = vst [vmem:[#allocation9_spill] sm:$0xff] %v2827_v55  ;;  %3246 = vst [vmem:[#allocation11_spill] sm:$0xff] %v2851_v59  ;;  %v2869_v62 = vld [vmem:[%s3241_s2 + $0x1f0] sm:$0xff]   ;;  %v2887_v32 = vld [vmem:[%s3241_s2 + $0x138] sm:$0xff]  }
  0x38   : > { %1896 = vmatpush3.bf16.msra.mxu0 %v2635_v21  ;;  %3247 = vst [vmem:[#allocation12_spill] sm:$0xff] %v2869_v62  ;;  %v2875_v63 = vld [vmem:[%s3241_s2 + $0x1b0] sm:$0xff]  }
  0x39   : > { %1897 = vmatprep.subr.bf16.mxu0 %v2653_v24  ;;  %3248 = vst [vmem:[#allocation13_spill] sm:$0xff] %v2875_v63  ;;  %v2253_v36 = vld [vmem:[%s2685_s10 + $0x10] ss:$36 sps:$4 sm:$0xff]  }
  0x3a   : > { %1918 = vmatpush3.bf16.msra.mxu1 %v2647_v23 }
  0x3b   : > { %1919 = vmatprep.subr.bf16.mxu1 %v2666_v26 }
  0x3c   : > { %1898 = vmatpush3.bf16.msra.mxu0 %v2660_v25 }
  0x3d   : > { %1899 = vmatprep.subr.bf16.mxu0 %v2678_v28 }
  0x3e   : > { %1920 = vmatpush3.bf16.msra.mxu1 %v2672_v27 }
  0x3f   : > { %1921 = vmatprep.subr.bf16.mxu1 %v2697_v30 }
  0x40   : > { %1900 = vmatpush3.bf16.msra.mxu0 %v2691_v29 }
  0x41   : > { %1929 = vmatprep.subr.bf16.mxu0 %v2711_v34 }
  0x42   : > { %1922 = vmatpush3.bf16.msra.mxu1 %v2706_v33 }
  0x43   : > { %1046 = vmatmul.mubr.bf16.vlgmr.msra.gmra.mrb[0].mxu0 %v2215_v31  ;;  %1951 = vmatprep.subr.bf16.mxu1 %v2725_v38  ;;  %v2881_v31 = vld [vmem:[%s3241_s2 + $0x178] sm:$0xff]  }
  0x44   : > { %1930 = vmatpush3.bf16.msra.mxu0 %v2720_v37 }
  0x45   : > { %1087 = vmatmul.mubr.bf16.vlgmr.msra.gmra.mrb[0].mxu1 %v2220_v35  ;;  %1931 = vmatprep.subr.bf16.mxu0 %v2737_v40  ;;  %v2893_v35 = vld [vmem:[%s3241_s2 + $0x1f8] sm:$0xff]  }
  0x46   : > { %1952 = vmatpush3.bf16.msra.mxu1 %v2731_v39 }
  0x47   : > { %1953 = vmatprep.subr.bf16.mxu1 %v2749_v42 }
  0x48   : > { %1932 = vmatpush3.bf16.msra.mxu0 %v2743_v41 }
  0x49   : > { %1933 = vmatprep.subr.bf16.mxu0 %v2761_v44 }
  0x4a   : > { %1954 = vmatpush3.bf16.msra.mxu1 %v2755_v43 }
  0x4b   : > { %1955 = vmatprep.subr.bf16.mxu1 %v2773_v46 }
  0x4c   : > { %1934 = vmatpush3.bf16.msra.mxu0 %v2767_v45 }
  0x4d   : > { %1935 = vmatprep.subr.bf16.mxu0 %v2785_v48 }
  0x4e   : > { %1956 = vmatpush3.bf16.msra.mxu1 %v2779_v47 }
  0x4f   : > { %1957 = vmatprep.subr.bf16.mxu1 %v2797_v50 }
  0x50   : > { %1936 = vmatpush3.bf16.msra.mxu0 %v2791_v49 }
  0x51   : > { %1937 = vmatprep.subr.bf16.mxu0 %v2809_v52 }
  0x52   : > { %1958 = vmatpush3.bf16.msra.mxu1 %v2803_v51 }
  0x53   : > { %1959 = vmatprep.subr.bf16.mxu1 %v2821_v54  ;;  %v2911_v54 = vld [vmem:[%s3241_s2 + $0x200] sm:$0xff]  }
  0x54   : > { %1938 = vmatpush3.bf16.msra.mxu0 %v2815_v53 }
  0x55   : > { %1939 = vmatprep.subr.bf16.mxu0 %v2833_v56 }
  0x56   : > { %1960 = vmatpush3.bf16.msra.mxu1 %v2827_v55  ;;  %v2259_v55 = vld [vmem:[%s2685_s10 + $0x1c] ss:$36 sps:$4 sm:$0xff]  }
  0x57   : > { %1961 = vmatprep.subr.bf16.mxu1 %v2845_v58  ;;  %v2257_v58 = vld [vmem:[%s2685_s10 + $0x18] ss:$36 sps:$4 sm:$0xff]   ;;  %1168 = vmatprep.mubr.bf16.mxu1 %v2259_v55 }
  0x58   : > { %1940 = vmatpush3.bf16.msra.mxu0 %v2839_v57 }
  0x59   : > { %1941 = vmatprep.subr.bf16.mxu0 %v2857_v60 }
  0x5a   : > { %1962 = vmatpush3.bf16.msra.mxu1 %v2851_v59  ;;  %v2402_v59 = vmov 0.0  }
  0x5b   : > { %1963 = vmatprep.subr.bf16.mxu1 %v2869_v62  ;;  %v2255_v62 = vld [vmem:[%s2685_s10 + $0x14] ss:$36 sps:$4 sm:$0xff]   ;;  %1550 = vst [vmem:[%s3111_s20] sm:$0x1] %v2402_v59 }
  0x5c   : > { %1942 = vmatpush3.bf16.msra.mxu0 %v2863_v61  ;;  %1127 = vmatprep.mubr.bf16.mxu0 %v2255_v62  ;;  %v2920_v62 = vld [vmem:[%s3241_s2 + $0x208] sm:$0xff]  }
  0x5d   : > { %1943 = vmatprep.subr.bf16.mxu0 %v2881_v31 }
  0x5e   : > { %1964 = vmatpush3.bf16.msra.mxu1 %v2875_v63  ;;  %v2902_v63 = vld [vmem:[%s3241_s2 + $0x1b8] sm:$0xff]  }
  0x5f   : > { %1965 = vmatprep.subr.bf16.mxu1 %v2893_v35 }
  0x60   : > { %1944 = vmatpush3.bf16.msra.mxu0 %v2887_v32 }
  0x61   : > { %2079 = vmatprep.subr.bf16.mxu0 %v2402_v59 }
  0x62   : > { %1966 = vmatpush3.bf16.msra.mxu1 %v2902_v63 }
  0x63   : > { %1128 = vmatmul.mubr.bf16.vlgmr.msra.gmra.mrb[4].mxu0 %v2253_v36  ;;  %1982 = vmatprep.subr.bf16.mxu1 %v2506_v0  ;;  %v2929_v0 = vld [vmem:[%s3241_s2 + $0x210] sm:$0xff]  }
  0x64   : > { %2095 = vmatprep.mubr.msk.bf16.mxu0 %vm2403_vm0, %v2402_v59  ;;  %2080 = vmatpush3.bf16.msra.mxu0 %v2911_v54 }
  0x65   : > { %1169 = vmatmul.mubr.bf16.vlgmr.msra.gmra.mrb[4].mxu1 %v2257_v58  ;;  %2081 = vmatprep.subr.bf16.mxu0 %v2402_v59 }
  0x66   : > { %1983 = vmatpush3.bf16.msra.mxu1 %v2511_v1  ;;  %v2271_v1 = vld [vmem:[%s2936_s30 + $0x4] ss:$36 sps:$4 sm:$0xff]  }
  0x67   : > { %1984 = vmatprep.subr.bf16.mxu1 %v2529_v4  ;;  %v2946_v4 = vld [vmem:[%s3241_s2 + $0x218] sm:$0xff]   ;;  %1308 = vmatprep.mubr.bf16.mxu1 %v2271_v1 }
  0x68   : > { %2082 = vmatpush3.bf16.msra.mxu0 %v2920_v62 }
  0x69   : > { %2083 = vmatprep.subr.bf16.mxu0 %v2402_v59 }
  0x6a   : > { %1985 = vmatpush3.bf16.msra.mxu1 %v2535_v5  ;;  %v2955_v5 = vld [vmem:[%s3241_s2 + $0x220] sm:$0xff]  }
  0x6b   : > { %1986 = vmatprep.subr.bf16.mxu1 %v2553_v8  ;;  %v2964_v8 = vld [vmem:[%s3241_s2 + $0x228] sm:$0xff]  }
  0x6c   : > { %2084 = vmatpush3.bf16.msra.mxu0 %v2929_v0 }
  0x6d   : > { %2085 = vmatprep.subr.bf16.mxu0 %v2402_v59 }
  0x6e   : > { %1987 = vmatpush3.bf16.msra.mxu1 %v2559_v9  ;;  %v2973_v9 = vld [vmem:[%s3241_s2 + $0x230] sm:$0xff]  }
  0x6f   : > { %1988 = vmatprep.subr.bf16.mxu1 %v2577_v12  ;;  %v2982_v12 = vld [vmem:[%s3241_s2 + $0x238] sm:$0xff]  }
  0x70   : > { %2086 = vmatpush3.bf16.msra.mxu0 %v2946_v4 }
  0x71   : > { %2087 = vmatprep.subr.bf16.mxu0 %v2402_v59 }
  0x72   : > { %1989 = vmatpush3.bf16.msra.mxu1 %v2583_v13  ;;  %v2268_v13 = vld [vmem:[%s2685_s10 + $0x20] ss:$36 sps:$4 sm:$0xff]  }
  0x73   : > { %1990 = vmatprep.subr.bf16.mxu1 %v2601_v16  ;;  %v2269_v16 = vld [vmem:[%s2936_s30] ss:$36 sps:$4 sm:$0xff]  }
  0x74   : > { %2088 = vmatpush3.bf16.msra.mxu0 %v2955_v5 }
  0x75   : > { %2089 = vmatprep.subr.bf16.mxu0 %v2402_v59 }
  0x76   : > { %1991 = vmatpush3.bf16.msra.mxu1 %v2608_v17  ;;  %v2274_v17 = vld [vmem:[%s2936_s30 + $0xc] ss:$36 sps:$4 sm:$0xff]  }
  0x77   : > { %1992 = vmatprep.subr.bf16.mxu1 %v2626_v20  ;;  %v2277_v20 = vld [vmem:[%s2936_s30 + $0x14] ss:$36 sps:$4 sm:$0xff]  }
  0x78   : > { %2090 = vmatpush3.bf16.msra.mxu0 %v2964_v8 }
  0x79   : > { %2091 = vmatprep.subr.bf16.mxu0 %v2402_v59 }
  0x7a   : > { %1993 = vmatpush3.bf16.msra.mxu1 %v2635_v21  ;;  %v2281_v21 = vld [vmem:[%s2936_s30 + $0x20] ss:$36 sps:$4 sm:$0xff]  }
  0x7b   : > { %1994 = vmatprep.subr.bf16.mxu1 %v2653_v24 }
  0x7c   : > { %2092 = vmatpush3.bf16.msra.mxu0 %v2973_v9 }
  0x7d   : > { %2093 = vmatprep.subr.bf16.mxu0 %v2402_v59 }
  0x7e   : > { %1995 = vmatpush3.bf16.msra.mxu1 %v2660_v25 }
  0x7f   : > { %1996 = vmatprep.subr.bf16.mxu1 %v2678_v28 }
  0x80   : > { %2094 = vmatpush3.bf16.msra.mxu0 %v2982_v12 }
  0x81   : > { %2004 = vmatprep.subr.bf16.mxu0 %v2517_v2  ;;  %v2272_v2 = vld [vmem:[%s2936_s30 + $0x8] ss:$36 sps:$4 sm:$0xff]  }
  0x82   : > { %1997 = vmatpush3.bf16.msra.mxu1 %v2691_v29 }
  0x83   : > { %2026 = vmatprep.subr.bf16.mxu1 %v2711_v34  ;;  %2096 = vmatmul.mubr.bf16.vlgmr.msra.gmra.mrb[8].mxu0 %v2268_v13 }
  0x84   : > { %2005 = vmatpush3.bf16.msra.mxu0 %v2523_v3  ;;  %1349 = vmatprep.mubr.bf16.mxu0 %v2274_v17  ;;  %v2275_v3 = vld [vmem:[%s2936_s30 + $0x10] ss:$36 sps:$4 sm:$0xff]  }
  0x85   : > { %1309 = vmatmul.mubr.bf16.vlgmr.msra.gmra.mrb[8].mxu1 %v2269_v16  ;;  %2006 = vmatprep.subr.bf16.mxu0 %v2541_v6  ;;  %v2280_v6 = vld [vmem:[%s2936_s30 + $0x1c] ss:$36 sps:$4 sm:$0xff]  }
  0x86   : > { %2027 = vmatpush3.bf16.msra.mxu1 %v2720_v37  ;;  %1390 = vmatprep.mubr.bf16.mxu1 %v2277_v20 }
  0x87   : > { %2028 = vmatprep.subr.bf16.mxu1 %v2737_v40 }
  0x88   : > { %2007 = vmatpush3.bf16.msra.mxu0 %v2547_v7  ;;  %v3250_v7 = vld [vmem:[#allocation8_spill] sm:$0xff] }
  0x89   : > { %2008 = vmatprep.subr.bf16.mxu0 %v2565_v10  ;;  %v3251_v10 = vld [vmem:[#allocation9_spill] sm:$0xff] }
  0x8a   : > { %2029 = vmatpush3.bf16.msra.mxu1 %v2743_v41 }
  0x8b   : > { %2030 = vmatprep.subr.bf16.mxu1 %v2761_v44 }
  0x8c   : > { %2009 = vmatpush3.bf16.msra.mxu0 %v2571_v11  ;;  %v3252_v11 = vld [vmem:[#allocation10_spill] sm:$0xff] }
  0x8d   : > { %2010 = vmatprep.subr.bf16.mxu0 %v2589_v14  ;;  %v3253_v14 = vld [vmem:[#allocation11_spill] sm:$0xff] }
  0x8e   : > { %2031 = vmatpush3.bf16.msra.mxu1 %v2767_v45 }
  0x8f   : > { %2032 = vmatprep.subr.bf16.mxu1 %v2785_v48 }
  0x90   : > { %2011 = vmatpush3.bf16.msra.mxu0 %v2595_v15  ;;  %v3254_v15 = vld [vmem:[#allocation12_spill] sm:$0xff] }
  0x91   : > { %2012 = vmatprep.subr.bf16.mxu0 %v2614_v18  ;;  %v3255_v18 = vld [vmem:[#allocation13_spill] sm:$0xff] }
  0x92   : > { %2033 = vmatpush3.bf16.msra.mxu1 %v2791_v49 }
  0x93   : > { %2034 = vmatprep.subr.bf16.mxu1 %v2809_v52 }
  0x94   : > { %2013 = vmatpush3.bf16.msra.mxu0 %v2620_v19  ;;  %v2278_v19 = vld [vmem:[%s2936_s30 + $0x18] ss:$36 sps:$4 sm:$0xff]   ;;  %s3072_s30 = sand.u32 1, %s2384_s25  }
  0x95   : > { %2014 = vmatprep.subr.bf16.mxu0 %v2641_v22  ;;  %s1761_s15 = sshll.u32 %s3072_s30, 3 }
  0x96   : > { %2035 = vmatpush3.bf16.msra.mxu1 %v2815_v53  ;;  %s3085_s12 = scalar_lea.vmem [#allocation2], %s1761_s15  ;;  %s3102_s16 = scalar_lea.vmem [#allocation4], %s1761_s15 }
  0x97   : > { %2036 = vmatprep.subr.bf16.mxu1 %v2833_v56  ;;  %s1578_s22 = sshll.u32 %s3085_s12, 4  ;;  %s3124_s22 = int_to_ptr.vmem [resolvable:$true] %s1578_s22 }
  0x98   : > { %2015 = vmatpush3.bf16.msra.mxu0 %v2647_v23  ;;  %v3067_v23 = vld [vmem:[%s3224_s3] ss:$0 sm:$0xff]  ;;  %s2290_s17 = scalar_lea.vmem %s3124_s22, 128  ;;  %p2297_p1 = scmp.lt.s32.totalorder %s3124_s22, %s2295_s19 }
  0x99   : > { %2016 = vmatprep.subr.bf16.mxu0 %v2666_v26  ;;  %p2291_p12 = scmp.ne.s32.totalorder %s3124_s22, %s2290_s17 }
  0x9a   : > { %2037 = vmatpush3.bf16.msra.mxu1 %v2839_v57 }
  0x9b   : > { %2038 = vmatprep.subr.bf16.mxu1 %v2857_v60  ;;  %p2292_p13 = pnand %p2291_p12, %p2488_p4 }
  0x9c   : > { %2017 = vmatpush3.bf16.msra.mxu0 %v2672_v27 }
  0x9d   : > { %2018 = vmatprep.subr.bf16.mxu0 %v2697_v30  ;;  %p2293_p0 = pneg %p2292_p13 }
  0x9e   : > { %2039 = vmatpush3.bf16.msra.mxu1 %v2863_v61 }
  0x9f   : > { %2040 = vmatprep.subr.bf16.mxu1 %v2881_v31 }
  0xa0   : > { %2019 = vmatpush3.bf16.msra.mxu0 %v2706_v33 }
  0xa1   : > { %2048 = vmatprep.subr.bf16.mxu0 %v2725_v38 }
  0xa2   : > { %2041 = vmatpush3.bf16.msra.mxu1 %v2887_v32 }
  0xa3   : > { %2099 = vmatprep.subr.bf16.mxu1 %v2402_v59  ;;  %1350 = vmatmul.mubr.bf16.vlgmr.msra.gmra.mrb[12].mxu0 %v2272_v2 }
  0xa4   : > { %2049 = vmatpush3.bf16.msra.mxu0 %v2731_v39  ;;  %1431 = vmatprep.mubr.bf16.mxu0 %v2280_v6 }
  0xa5   : > { %1391 = vmatmul.mubr.bf16.vlgmr.msra.gmra.mrb[12].mxu1 %v2275_v3  ;;  %2050 = vmatprep.subr.bf16.mxu0 %v2749_v42 }
  0xa6   : > { %2100 = vmatpush3.bf16.msra.mxu1 %v2911_v54  ;;  %2115 = vmatprep.mubr.msk.bf16.mxu1 %vm2403_vm0, %v2402_v59 }
  0xa7   : > { %2101 = vmatprep.subr.bf16.mxu1 %v2402_v59 }
  0xa8   : > { %2051 = vmatpush3.bf16.msra.mxu0 %v2755_v43 }
  0xa9   : > { %2052 = vmatprep.subr.bf16.mxu0 %v2773_v46 }
  0xaa   : > { %2102 = vmatpush3.bf16.msra.mxu1 %v2920_v62 }
  0xab   : > { %2103 = vmatprep.subr.bf16.mxu1 %v2402_v59 }
  0xac   : > { %2053 = vmatpush3.bf16.msra.mxu0 %v2779_v47 }
  0xad   : > { %2054 = vmatprep.subr.bf16.mxu0 %v2797_v50 }
  0xae   : > { %2104 = vmatpush3.bf16.msra.mxu1 %v2929_v0 }
  0xaf   : > { %2105 = vmatprep.subr.bf16.mxu1 %v2402_v59 }
  0xb0   : > { %2055 = vmatpush3.bf16.msra.mxu0 %v2803_v51 }
  0xb1   : > { %2056 = vmatprep.subr.bf16.mxu0 %v3250_v7 }
  0xb2   : > { %2106 = vmatpush3.bf16.msra.mxu1 %v2946_v4 }
  0xb3   : > { %2107 = vmatprep.subr.bf16.mxu1 %v2402_v59 }
  0xb4   : > { %2057 = vmatpush3.bf16.msra.mxu0 %v3251_v10 }
  0xb5   : > { %2058 = vmatprep.subr.bf16.mxu0 %v3252_v11 }
  0xb6   : > { %2108 = vmatpush3.bf16.msra.mxu1 %v2955_v5 }
  0xb7   : > { %2109 = vmatprep.subr.bf16.mxu1 %v2402_v59 }
  0xb8   : > { %2059 = vmatpush3.bf16.msra.mxu0 %v3253_v14 }
  0xb9   : > { %2060 = vmatprep.subr.bf16.mxu0 %v3254_v15 }
  0xba   : > { %2110 = vmatpush3.bf16.msra.mxu1 %v2964_v8 }
  0xbb   : > { %2111 = vmatprep.subr.bf16.mxu1 %v2402_v59 }
  0xbc   : > { %2061 = vmatpush3.bf16.msra.mxu0 %v3255_v18 }
  0xbd   : > { %2062 = vmatprep.subr.bf16.mxu0 %v2893_v35 }
  0xbe   : > { %2112 = vmatpush3.bf16.msra.mxu1 %v2973_v9 }
  0xbf   : > { %2113 = vmatprep.subr.bf16.mxu1 %v2402_v59 }
  0xc0   : > { %2063 = vmatpush3.bf16.msra.mxu0 %v2902_v63 }
  0xc2   : > { %2114 = vmatpush3.bf16.msra.mxu1 %v2982_v12 }
  0xc3   : > { %1432 = vmatmul.mubr.bf16.vlgmr.msra.gmra.mrb[16].mxu0 %v2278_v19 }
  0xc5   : > { %2116 = vmatmul.mubr.bf16.vlgmr.msra.gmra.mrb[16].mxu1 %v2281_v21 }
 0x116   : > { %v1901_v22 = vpop.f32.mrb[0].mxu0 }
 0x117   : > { %v1902_v24 = vpop.f32.mrb[1].mxu0 }
 0x118   : > { %v1903_v25 = vadd.f32 %v1902_v24, %v1901_v22  ;;  %v1904_v26 = vpop.f32.mrb[2].mxu0  ;;  %v1923_v27 = vpop.f32.mrb[0].mxu1 }
 0x119   : > { %v1905_v28 = vpop.f32.mrb[3].mxu0  ;;  %v1924_v33 = vpop.f32.mrb[1].mxu1 }
 0x11a   : > { %v1048_v29 = vadd.f32 %v1903_v25, %v3067_v23  ;;  %v1906_v30 = vadd.f32 %v1905_v28, %v1904_v26  ;;  %v1925_v34 = vadd.f32 %v1924_v33, %v1923_v27  ;;  %v1926_v37 = vpop.f32.mrb[2].mxu1 }
 0x11b   : > { %v1927_v39 = vpop.f32.mrb[3].mxu1 }
 0x11c   : > { %v1051_v38 = vadd.f32 %v1906_v30, %v3067_v23  ;;  %v1089_v40 = vadd.f32 %v1925_v34, %v1048_v29  ;;  %v1928_v41 = vadd.f32 %v1927_v39, %v1926_v37 }
 0x11e   : > { %v1092_v42 = vadd.f32 %v1928_v41, %v1051_v38 }
 0x136   : > { %v1945_v43 = vpop.f32.mrb[4].mxu0 }
 0x137   : > { %v1946_v44 = vpop.f32.mrb[5].mxu0 }
 0x138   : > { %v1947_v45 = vadd.f32 %v1946_v44, %v1945_v43  ;;  %v1948_v46 = vpop.f32.mrb[6].mxu0  ;;  %v1967_v47 = vpop.f32.mrb[4].mxu1 }
 0x139   : > { %v1949_v48 = vpop.f32.mrb[7].mxu0  ;;  %v1968_v51 = vpop.f32.mrb[5].mxu1 }
 0x13a   : > { %v1130_v49 = vadd.f32 %v1947_v45, %v1089_v40  ;;  %v1950_v50 = vadd.f32 %v1949_v48, %v1948_v46  ;;  %v1969_v52 = vadd.f32 %v1968_v51, %v1967_v47  ;;  %v1970_v53 = vpop.f32.mrb[6].mxu1 }
 0x13b   : > { %v1971_v55 = vpop.f32.mrb[7].mxu1 }
 0x13c   : > { %v1133_v54 = vadd.f32 %v1950_v50, %v1092_v42  ;;  %v1972_v56 = vadd.f32 %v1971_v55, %v1970_v53  ;;  %v1171_v57 = vadd.f32 %v1969_v52, %v1130_v49 }
 0x13e   : > { %v1174_v58 = vadd.f32 %v1972_v56, %v1133_v54 }
 0x156   : > { %v1211_v60 = vpop.f32.mrb[8].mxu0 }
 0x157   : > { %v1212_v61 = vadd.f32 %v1211_v60, %v1171_v57  ;;  %v2097_v63 = vpop.f32.mrb[9].mxu0 }
 0x158   : > { %v1998_v31 = vpop.f32.mrb[8].mxu1  ;;  %v1214_v32 = vpop.f32.mrb[10].mxu0 }
 0x159   : > { %v1999_v35 = vpop.f32.mrb[9].mxu1  ;;  %v3074_v36 = vmax.f32 %v1212_v61, 0.0  ;;  %v1215_v62 = vadd.f32 %v1214_v32, %v1174_v58  ;;  %v2098_v0 = vpop.f32.mrb[11].mxu0 }
 0x15a   : > { %v2000_v1 = vadd.f32 %v1999_v35, %v1998_v31  ;;  %v2001_v4 = vpop.f32.mrb[10].mxu1 }
 0x15b   : > { %v2002_v5 = vpop.f32.mrb[11].mxu1  ;;  %v3077_v8 = vmax.f32 %v1215_v62, 0.0  ;;  %v1503_v12 = vmul.f32 %v3074_v36, %v3074_v36 }
 0x15c   : > { %v2003_v9 = vadd.f32 %v2002_v5, %v2001_v4  ;;  %v1311_v3 = vadd.f32 %v2000_v1, %v3067_v23 }
 0x15d   : > { %v1878_v13 = vpack.c.bf16 %v3077_v8, %v3074_v36  ;;  %1505 = vadd.xlane.f32.xlu0 %v1503_v12  ;;  %v1504_v16 = vmul.f32 %v3077_v8, %v3077_v8 }
 0x15e   : > { %v1314_v18 = vadd.f32 %v2003_v9, %v3067_v23 }
 0x15f   : > { %1879 = vst [vmem:[%s3085_s12] sm:$0xff] %v1878_v13   ;;  %s2296_s12 = scalar_lea.vmem %s2295_s19, 256 }
 0x160   : > { %p2298_p2 = scmp.lt.s32.totalorder %s2296_s12, %s2290_s17 }
 0x161   : > { %1507 = vadd.xlane.f32.xlu0 %v1504_v16 }
 0x162   : > { %p2299_p3 = por %p2298_p2, %p2297_p1 }
 0x164   : > { %p2300_p5 = pnand %p2299_p3, %p2293_p0 }
 0x176   : > { %v2020_v17 = vpop.f32.mrb[12].mxu0 }
 0x177   : > { %v2021_v20 = vpop.f32.mrb[13].mxu0 }
 0x178   : > { %v2042_v2 = vpop.f32.mrb[12].mxu1  ;;  %v2022_v6 = vadd.f32 %v2021_v20, %v2020_v17  ;;  %v2023_v7 = vpop.f32.mrb[14].mxu0 }
 0x179   : > { %v2043_v10 = vpop.f32.mrb[13].mxu1  ;;  %v2024_v11 = vpop.f32.mrb[15].mxu0 }
 0x17a   : > { %v2044_v14 = vadd.f32 %v2043_v10, %v2042_v2  ;;  %v2045_v15 = vpop.f32.mrb[14].mxu1  ;;  %v1352_v19 = vadd.f32 %v2022_v6, %v1311_v3  ;;  %v2025_v21 = vadd.f32 %v2024_v11, %v2023_v7 }
 0x17b   : > { %v2046_v22 = vpop.f32.mrb[15].mxu1 }
 0x17c   : > { %v2047_v24 = vadd.f32 %v2046_v22, %v2045_v15  ;;  %v1355_v25 = vadd.f32 %v2025_v21, %v1314_v18  ;;  %v1393_v26 = vadd.f32 %v2044_v14, %v1352_v19 }
 0x17e   : > { %v1396_v27 = vadd.f32 %v2047_v24, %v1355_v25 }
 0x196   : > { %v2064_v28 = vpop.f32.mrb[16].mxu0 }
 0x197   : > { %v2065_v29 = vpop.f32.mrb[17].mxu0 }
 0x198   : > { %v1474_v30 = vpop.f32.mrb[16].mxu1  ;;  %v2066_v33 = vadd.f32 %v2065_v29, %v2064_v28  ;;  %v2067_v34 = vpop.f32.mrb[18].mxu0 }
 0x199   : > { %v2117_v37 = vpop.f32.mrb[17].mxu1  ;;  %v2068_v38 = vpop.f32.mrb[19].mxu0 }
 0x19a   : > { %v1477_v39 = vpop.f32.mrb[18].mxu1  ;;  %v1434_v40 = vadd.f32 %v2066_v33, %v1393_v26  ;;  %v2069_v41 = vadd.f32 %v2068_v38, %v2067_v34 }
 0x19b   : > { %v2118_v23 = vpop.f32.mrb[19].mxu1 }
 0x19c   : > { %v1475_v42 = vadd.f32 %v1474_v30, %v1434_v40  ;;  %v1437_v43 = vadd.f32 %v2069_v41, %v1396_v27 }
 0x19e   : > { %v3092_v44 = vmax.f32 %v1475_v42, 0.0  ;;  %v1478_v45 = vadd.f32 %v1477_v39, %v1437_v43 }
 0x1a0   : > { %v3094_v46 = vmax.f32 %v1478_v45, 0.0  ;;  %v1515_v47 = vmul.f32 %v3092_v44, %v3092_v44 }
 0x1a2   : > { %v1883_v48 = vpack.c.bf16 %v3094_v46, %v3092_v44  ;;  %1517 = vadd.xlane.f32.xlu1 %v1515_v47  ;;  %v1516_v49 = vmul.f32 %v3094_v46, %v3094_v46 }
 0x1a4   : > { %1884 = vst [vmem:[%s3102_s16] sm:$0xff] %v1883_v48  }
 0x1a6   : > { %1519 = vadd.xlane.f32.xlu1 %v1516_v49 }
 0x1a7   : > { %2303 = shalt.err (!%p2300_p5)
}
 0x1a8   : > { %s2304_s23 = scalar_lea.hbm %s3122_s8, 128  ;;  %s2308_s18 = scalar_lea.hbm %s3226_s5, 256 }
 0x1a9   : > { %p2305_p6 = scmp.ne.s32.totalorder %s3122_s8, %s2304_s23  ;;  %p2309_p10 = scmp.lt.u32.totalorder %s3122_s8, %s3226_s5 }
 0x1aa   : > { %p2310_p11 = scmp.lt.u32.totalorder %s2308_s18, %s2304_s23  ;;  %p2312_p13 = scmp.lt.u32.totalorder %s2304_s23, %s3122_s8 }
 0x1ab   : > { %p2306_p7 = pnand %p2305_p6, %p2488_p4 }
 0x1ac   : > { %p2311_p12 = por %p2310_p11, %p2309_p10 }
 0x1ad   : > { %p2307_p9 = pneg %p2306_p7 }
 0x1ae   : > { %p2313_p0 = por %p2312_p13, %p2311_p12 }
 0x1b0   : > { %p2314_p1 = pnand %p2313_p0, %p2307_p9 }
 0x1b2   : > { %2317 = shalt.err (!%p2314_p1)
}
 0x1b3   : > { %s2405_s17 = smov 64   ;;  %s2406_s21 = smov 4  }
 0x1b4   : > { %s3256_s15 = scalar_lea.sflag [#allocation3], %s3072_s30  ;;  %s3257_s12 = sshll.u32 %s2392_s27, 7 }
 0x1b5   : > { %2120 = dma.vmem_to_hbm [thread:$0]  (%p2488_p4), %s3124_s22, 128, %s3122_s8, %s3256_s15, %s2405_s17, %s2405_s17, %s2406_s21  }
 0x1b6   : > { %s3158_s18 = scalar_lea.hbm %s3227_s6, %s3257_s12  ;;  %s1596_s19 = sshll.u32 %s3102_s16, 4  ;;  %s3161_s19 = int_to_ptr.vmem [resolvable:$true] %s1596_s19 }
 0x1b7   : > { %s1560_s0 = scalar_lea.sflag [#allocation5], %s3072_s30  ;;  %s2318_s1 = scalar_lea.vmem %s3161_s19, 128 }
 0x1b8   : > { %p2319_p2 = scmp.ne.s32.totalorder %s3161_s19, %s2318_s1  ;;  %s2407_s2 = smov [#allocation4]  }
 0x1b9   : > { %s2322_s22 = sshll.u32 %s2407_s2, 4  ;;  %s2323_s22 = int_to_ptr.vmem [resolvable:$false] %s2322_s22 }
 0x1ba   : > { %p2320_p3 = pnand %p2319_p2, %p2488_p4  ;;  %s2324_s27 = scalar_lea.vmem %s2323_s22, 256 }
 0x1bb   : > { %p2325_p6 = scmp.lt.s32.totalorder %s3161_s19, %s2323_s22  ;;  %p2326_p7 = scmp.lt.s32.totalorder %s2324_s27, %s2318_s1 }
 0x1bc   : > { %p2321_p5 = pneg %p2320_p3 }
 0x1bd   : > { %p2327_p9 = por %p2326_p7, %p2325_p6 }
 0x1bf   : > { %p2328_p10 = pnand %p2327_p9, %p2321_p5 }
 0x1c1   : > { %2331 = shalt.err (!%p2328_p10)
}
 0x1c2   : > { %s2332_s16 = scalar_lea.hbm %s3158_s18, 128  ;;  %s2336_s2 = scalar_lea.hbm %s3227_s6, 256 }
 0x1c3   : > { %p2333_p11 = scmp.ne.s32.totalorder %s3158_s18, %s2332_s16  ;;  %p2337_p0 = scmp.lt.u32.totalorder %s3158_s18, %s3227_s6 }
 0x1c4   : > { %p2338_p1 = scmp.lt.u32.totalorder %s2336_s2, %s2332_s16  ;;  %p2340_p3 = scmp.lt.u32.totalorder %s2332_s16, %s3158_s18 }
 0x1c5   : > { %p2334_p12 = pnand %p2333_p11, %p2488_p4 }
 0x1c6   : > { %p2339_p2 = por %p2338_p1, %p2337_p0 }
 0x1c7   : > { %p2335_p13 = pneg %p2334_p12 }
 0x1c8   : > { %p2341_p5 = por %p2340_p3, %p2339_p2 }
 0x1ca   : > { %p2342_p6 = pnand %p2341_p5, %p2335_p13 }
 0x1cc   : > { %2345 = shalt.err (!%p2342_p6)
}
 0x1cd   : > { %2121 = dma.vmem_to_hbm [thread:$0]  (%p2488_p4), %s3161_s19, 128, %s3158_s18, %s1560_s0, %s2405_s17, %s2405_s17, %s2406_s21  }
 0x1ce   : > { %v1860_v4 = vld [vmem:[%s3225_s4] ss:$0 sm:$0xff] }
 0x1cf   : > { %v1551_v3 = vld [vmem:[%s3111_s20] sm:$0x1] }
 0x1ea   : > { %v1506_v59 = vpop.xlane.xlu0 %1505 }
 0x1eb   : > { %v1509_v50 = vadd.f32 1e-20, %v1506_v59 }
 0x1ed   : > { %2282 = vrsqrt.f32 %v1509_v50 }
 0x1ee   : > { %v1508_v51 = vpop.xlane.xlu0 %1507 }
 0x1ef   : > { %v1510_v53 = vadd.f32 1e-20, %v1508_v51 }
 0x1f7   : > { %v2283_v57 = vpop.eup %2282 }
 0x1f8   : > { %v1513_v60 = vmul.f32 %v2283_v57, %v3074_v36 }
 0x22f   : > { %v1518_v52 = vpop.xlane.xlu1 %1517 }
 0x230   : > { %v1521_v54 = vadd.f32 1e-20, %v1518_v52 }
 0x232   : > { %2284 = vrsqrt.f32 %v1521_v54 }
 0x233   : > { %v1520_v55 = vpop.xlane.xlu1 %1519  ;;  %2286 = vrsqrt.f32 %v1510_v53 }
 0x234   : > { %v1522_v56 = vadd.f32 1e-20, %v1520_v55 }
 0x236   : > { %2288 = vrsqrt.f32 %v1522_v56 }
 0x23c   : > { %v2285_v58 = vpop.eup %2284 }
 0x23d   : > { %v1525_v61 = vmul.f32 %v2285_v58, %v3092_v44  ;;  %v2287_v63 = vpop.eup %2286 }
 0x23e   : > { %v1514_v35 = vmul.f32 %v2287_v63, %v3077_v8 }
 0x23f   : > { %v1527_v31 = vsub.f32 %v1513_v60, %v1525_v61 }
 0x240   : > { %v2289_v32 = vpop.eup %2288 }
 0x241   : > { %v1526_v62 = vmul.f32 %v2289_v32, %v3094_v46  ;;  %v1529_v0 = vmul.f32 %v1527_v31, %v1527_v31 }
 0x243   : > { %v1528_v1 = vsub.f32 %v1514_v35, %v1526_v62  ;;  %v1537_v9 = vmul.f32 %v1860_v4, %v1529_v0 }
 0x245   : > { %v1530_v5 = vmul.f32 %v1528_v1, %v1528_v1 }
 0x247   : > { %v1538_v36 = vmul.f32 %v1860_v4, %v1530_v5 }
 0x249   : > { %v1539_v12 = vadd.f32 %v1538_v36, %v1537_v9 }
 0x24b   : > { %v1540_v13 = vrot.slane %v1539_v12, 4 }
 0x24d   : > { %v1541_v16 = vadd.f32 %v1540_v13, %v1539_v12 }
 0x24f   : > { %v1542_v17 = vrot.slane %v1541_v16, 2 }
 0x251   : > { %v1543_v20 = vadd.f32 %v1542_v17, %v1541_v16 }
 0x253   : > { %v1544_v2 = vrot.slane %v1543_v20, 1 }
 0x255   : > { %v1545_v8 = vadd.f32 %v1544_v2, %v1543_v20 }
 0x257   : > { %v1552_v6 = vadd.f32 %v1551_v3, %v1545_v8 }
 0x259   : > { %1553 = vst [vmem:[%s3111_s20] sm:$0x1] %v1552_v6 }
 0x25a PF: > { %p2131_p4 = scmp.ge.s32.totalorder %s2400_s29, 2  ;;  %s1614_s11 = sand.u32 1, %s2380_s24  }
 0x25b   : > { %s1615_s30 = scalar_lea.sflag [#allocation3], %s1614_s11 }
 0x25c   : > { %p2125_p7 = pnand %p2131_p4, %p2495_p8 }
 0x25e   : > { %2371 = dma.done.wait (!%p2125_p7), %s1615_s30, 128  }
 0x25f   : > { %2373 = vsyncadd (!%p2125_p7), %s1615_s30, 4294967168  ;;  %s1624_s17 = scalar_lea.sflag [#allocation5], %s1614_s11 }
 0x260   : > { %2375 = dma.done.wait (!%p2125_p7), %s1624_s17, 128  }
 0x261   : > { %2377 = vsyncadd (!%p2125_p7), %s1624_s17, 4294967168  ;;  %s24_s29 = sadd.s32 1, %s2400_s29   ;;  %s3258_s24 = smov %s2384_s25 }
 0x262   : > { %p21_p9 = scmp.ge.s32.totalorder %s24_s29, 4   ;;  %s3259_s25 = smov %s2388_s26 }
 0x263   : > { %s3260_s26 = smov %s2501_s14  ;;  %s3261_s27 = smov %s2396_s28 }
 0x264   : > { %s3262_s28 = smov %s3264_s9  ;;  %23 = sbr.rel (!%p21_p9) target bundleno = 10 (0xa), region = 111 }
 0x26b   :  { %1635 = vsyncpa [#allocation3], 1 }
 0x26c   :  { %1637 = vsyncpa [#allocation3 + $0x1], 1 }
 0x26d   :  { %1638 = vsyncpa [#allocation5], 1 }
 0x26e   :  { %1640 = vsyncpa [#allocation5 + $0x1], 1 }

// kernel: lpips_forward.6
= control target key start
LH: loop header
LB: loop body
LE: loop exit
PB: predicated region body
PF: predicated region fallthrough
CT: control target
= control target key end

     0   :  { %s2318_s24 = smov 0   ;;  %s2320_s25 = smov 0   ;;  %s2953_s0 = inlined_call_operand.vmem [shape: bf16[2,16,1152], index: 0, kind: input, shape index: {}]   ;;  %s2954_s1 = inlined_call_operand.vmem [shape: bf16[2,16,1152], index: 1, kind: input, shape index: {}]   ;;  %s2955_s2 = inlined_call_operand.vmem [shape: bf16[1152,128], index: 2, kind: input, shape index: {}]   ;;  %s2956_s3 = inlined_call_operand.vmem [shape: f32[1,128], index: 3, kind: input, shape index: {}]   ;;  %s2957_s4 = inlined_call_operand.vmem [shape: f32[1,128], index: 4, kind: input, shape index: {}]   ;;  %s2958_s5 = inlined_call_operand.vmem [shape: bf16[2,16,128], index: 5, kind: output, shape index: {0}]   ;;  %s2959_s6 = inlined_call_operand.vmem [shape: bf16[2,16,128], index: 6, kind: output, shape index: {1}]   ;;  %s2960_s7 = inlined_call_operand.vmem [shape: f32[2,1,128], index: 7, kind: output, shape index: {2}]  }
   0x1   :  { %s2322_s26 = smov 0  }
   0x2 LB: > { %s30_s27 = sadd.s32 1, %s2270_s25  ;;  %p1764_p0 = scmp.ge.s32.totalorder %s2274_s26, 1  ;;  %s2274_s26 = sphi %s2322_s26, %s18_s26   ;;  %s2270_s25 = sphi %s2320_s25, %s2980_s25   ;;  %s2266_s24 = sphi %s2318_s24, %s2979_s24  }
   0x3   : > { %p32_p1 = scmp.ge.s32.totalorder %s30_s27, 2  ;;  %p284_p2 = scmp.lt.s32.totalorder %s2274_s26, 3 }
   0x5   : > { %s2982_s27 = smov (%p32_p1, %s30_s27), 0  ;;  %p285_p3 = pnand %p1764_p0, %p284_p2 }
   0x7   : > { %288 = sbr.rel (%p285_p3) target bundleno = 582 (0x246), region = 40 }
   0xe   : > { %v2341_v0 = vld [vmem:[%s2955_s2 + $0x40] sm:$0xff]   ;;  %v2364_v4 = vld [vmem:[%s2955_s2 + $0x48] sm:$0xff]   ;;  %v2388_v8 = vld [vmem:[%s2955_s2 + $0x50] sm:$0xff]   ;;  %p348_p4 = scmp.lt.s32.totalorder %s2266_s24, 1  ;;  %vm2277_vm0 = vmmov 0  }
   0xf   : > { %v2346_v1 = vld [vmem:[%s2955_s2] sm:$0xff]   ;;  %1885 = vmatprep.subr.bf16.mxu0 %v2341_v0  ;;  %v2370_v5 = vld [vmem:[%s2955_s2 + $0x8] sm:$0xff]   ;;  %v2394_v9 = vld [vmem:[%s2955_s2 + $0x10] sm:$0xff]  }
  0x10   : > { %v2352_v2 = vld [vmem:[%s2955_s2 + $0xc0] sm:$0xff]   ;;  %1886 = vmatpush3.bf16.msra.mxu0 %v2346_v1  ;;  %v2376_v6 = vld [vmem:[%s2955_s2 + $0xc8] sm:$0xff]   ;;  %v2400_v10 = vld [vmem:[%s2955_s2 + $0xd0] sm:$0xff]   ;;  %s2984_s24 = smov (!%p348_p4, %s2266_s24), 1 }
  0x11   : > { %v2358_v3 = vld [vmem:[%s2955_s2 + $0x80] sm:$0xff]   ;;  %1907 = vmatprep.subr.bf16.mxu1 %v2352_v2  ;;  %1887 = vmatprep.subr.bf16.mxu0 %v2364_v4  ;;  %v2382_v7 = vld [vmem:[%s2955_s2 + $0x88] sm:$0xff]   ;;  %v2406_v11 = vld [vmem:[%s2955_s2 + $0x90] sm:$0xff]   ;;  %s2119_s17 = smul.u32 72, %s2984_s24  ;;  %s1869_s14 = sshll.u32 %s2984_s24, 3 }
  0x12   : > { %1908 = vmatpush3.bf16.msra.mxu1 %v2358_v3  ;;  %v2412_v12 = vld [vmem:[%s2955_s2 + $0x58] sm:$0xff]   ;;  %v2436_v16 = vld [vmem:[%s2955_s2 + $0x60] sm:$0xff]   ;;  %v2461_v20 = vld [vmem:[%s2955_s2 + $0x68] sm:$0xff]   ;;  %s377_s18 = scalar_lea.vmem %s2958_s5, %s1869_s14 }
  0x13   : > { %1909 = vmatprep.subr.bf16.mxu1 %v2376_v6  ;;  %v2418_v13 = vld [vmem:[%s2955_s2 + $0x18] sm:$0xff]   ;;  %v2443_v17 = vld [vmem:[%s2955_s2 + $0x20] sm:$0xff]   ;;  %v2470_v21 = vld [vmem:[%s2955_s2 + $0x28] sm:$0xff]   ;;  %s2520_s9 = scalar_lea.vmem %s2953_s0, %s2119_s17  ;;  %s2771_s21 = scalar_lea.vmem %s2954_s1, %s2119_s17 }
  0x14   : > { %1888 = vmatpush3.bf16.msra.mxu0 %v2370_v5  ;;  %v2424_v14 = vld [vmem:[%s2955_s2 + $0xd8] sm:$0xff]   ;;  %v2449_v18 = vld [vmem:[%s2955_s2 + $0xe0] sm:$0xff]   ;;  %v2476_v22 = vld [vmem:[%s2955_s2 + $0xe8] sm:$0xff]   ;;  %s2933_s17 = scalar_lea.vmem %s2960_s7, %s2984_s24 }
  0x15   : > { %1889 = vmatprep.subr.bf16.mxu0 %v2388_v8  ;;  %v2430_v15 = vld [vmem:[%s2955_s2 + $0x98] sm:$0xff]   ;;  %v2455_v19 = vld [vmem:[%s2955_s2 + $0xa0] sm:$0xff]   ;;  %v2482_v23 = vld [vmem:[%s2955_s2 + $0xa8] sm:$0xff]  }
  0x16   : > { %1910 = vmatpush3.bf16.msra.mxu1 %v2382_v7  ;;  %v2488_v24 = vld [vmem:[%s2955_s2 + $0x70] sm:$0xff]   ;;  %v2513_v28 = vld [vmem:[%s2955_s2 + $0x78] sm:$0xff]   ;;  %v2177_v31 = vld [vmem:[%s2520_s9] ss:$36 sps:$4 sm:$0xff]  }
  0x17   : > { %1911 = vmatprep.subr.bf16.mxu1 %v2400_v10  ;;  %v2495_v25 = vld [vmem:[%s2955_s2 + $0x30] sm:$0xff]   ;;  %v2526_v29 = vld [vmem:[%s2955_s2 + $0x38] sm:$0xff]   ;;  %v2179_v32 = vld [vmem:[%s2520_s9 + $0x4] ss:$36 sps:$4 sm:$0xff]  }
  0x18   : > { %1890 = vmatpush3.bf16.msra.mxu0 %v2394_v9  ;;  %v2501_v26 = vld [vmem:[%s2955_s2 + $0xf0] sm:$0xff]   ;;  %v2532_v30 = vld [vmem:[%s2955_s2 + $0xf8] sm:$0xff]   ;;  %1065 = vmatprep.mubr.bf16.mxu0 %v2179_v32  ;;  %v2546_v34 = vld [vmem:[%s2955_s2 + $0x140] sm:$0xff]  }
  0x19   : > { %1891 = vmatprep.subr.bf16.mxu0 %v2412_v12  ;;  %v2507_v27 = vld [vmem:[%s2955_s2 + $0xb0] sm:$0xff]   ;;  %v2541_v33 = vld [vmem:[%s2955_s2 + $0xb8] sm:$0xff]   ;;  %v2182_v35 = vld [vmem:[%s2520_s9 + $0x8] ss:$36 sps:$4 sm:$0xff]  }
  0x1a   : > { %1912 = vmatpush3.bf16.msra.mxu1 %v2406_v11  ;;  %v2184_v36 = vld [vmem:[%s2520_s9 + $0xc] ss:$36 sps:$4 sm:$0xff]   ;;  %v2555_v37 = vld [vmem:[%s2955_s2 + $0x100] sm:$0xff]   ;;  %v2620_v48 = vld [vmem:[%s2955_s2 + $0x158] sm:$0xff]  }
  0x1b   : > { %1913 = vmatprep.subr.bf16.mxu1 %v2424_v14  ;;  %1106 = vmatprep.mubr.bf16.mxu1 %v2184_v36  ;;  %v2560_v38 = vld [vmem:[%s2955_s2 + $0x1c0] sm:$0xff]   ;;  %v2572_v40 = vld [vmem:[%s2955_s2 + $0x148] sm:$0xff]   ;;  %v2596_v44 = vld [vmem:[%s2955_s2 + $0x150] sm:$0xff]  }
  0x1c   : > { %1892 = vmatpush3.bf16.msra.mxu0 %v2418_v13  ;;  %v2566_v39 = vld [vmem:[%s2955_s2 + $0x180] sm:$0xff]   ;;  %v2578_v41 = vld [vmem:[%s2955_s2 + $0x108] sm:$0xff]   ;;  %v2602_v45 = vld [vmem:[%s2955_s2 + $0x110] sm:$0xff]  }
  0x1d   : > { %1893 = vmatprep.subr.bf16.mxu0 %v2436_v16  ;;  %v2584_v42 = vld [vmem:[%s2955_s2 + $0x1c8] sm:$0xff]   ;;  %v2608_v46 = vld [vmem:[%s2955_s2 + $0x1d0] sm:$0xff]   ;;  %v2626_v49 = vld [vmem:[%s2955_s2 + $0x118] sm:$0xff]  }
  0x1e   : > { %1914 = vmatpush3.bf16.msra.mxu1 %v2430_v15  ;;  %v2590_v43 = vld [vmem:[%s2955_s2 + $0x188] sm:$0xff]   ;;  %v2614_v47 = vld [vmem:[%s2955_s2 + $0x190] sm:$0xff]   ;;  %v2632_v50 = vld [vmem:[%s2955_s2 + $0x1d8] sm:$0xff]  }
  0x1f   : > { %1915 = vmatprep.subr.bf16.mxu1 %v2449_v18  ;;  %v2638_v51 = vld [vmem:[%s2955_s2 + $0x198] sm:$0xff]   ;;  %v2644_v52 = vld [vmem:[%s2955_s2 + $0x160] sm:$0xff]   ;;  %v2668_v56 = vld [vmem:[%s2955_s2 + $0x168] sm:$0xff]  }
  0x20   : > { %1894 = vmatpush3.bf16.msra.mxu0 %v2443_v17  ;;  %v2650_v53 = vld [vmem:[%s2955_s2 + $0x120] sm:$0xff]   ;;  %v2674_v57 = vld [vmem:[%s2955_s2 + $0x128] sm:$0xff]   ;;  %v2692_v60 = vld [vmem:[%s2955_s2 + $0x170] sm:$0xff]  }
  0x21   : > { %1895 = vmatprep.subr.bf16.mxu0 %v2461_v20  ;;  %v2656_v54 = vld [vmem:[%s2955_s2 + $0x1e0] sm:$0xff]   ;;  %v2680_v58 = vld [vmem:[%s2955_s2 + $0x1e8] sm:$0xff]   ;;  %v2698_v61 = vld [vmem:[%s2955_s2 + $0x130] sm:$0xff]  }
  0x22   : > { %1916 = vmatpush3.bf16.msra.mxu1 %v2455_v19  ;;  %2967 = vst [vmem:[#allocation2_spill] sm:$0xff] %v2656_v54  ;;  %v2662_v55 = vld [vmem:[%s2955_s2 + $0x1a0] sm:$0xff]   ;;  %2969 = vst [vmem:[#allocation4_spill] sm:$0xff] %v2680_v58  ;;  %v2686_v59 = vld [vmem:[%s2955_s2 + $0x1a8] sm:$0xff]  }
  0x23   : > { %1917 = vmatprep.subr.bf16.mxu1 %v2476_v22  ;;  %2968 = vst [vmem:[#allocation3_spill] sm:$0xff] %v2662_v55  ;;  %2970 = vst [vmem:[#allocation5_spill] sm:$0xff] %v2686_v59  ;;  %v2704_v62 = vld [vmem:[%s2955_s2 + $0x1f0] sm:$0xff]   ;;  %v2722_v32 = vld [vmem:[%s2955_s2 + $0x138] sm:$0xff]  }
  0x24   : > { %1896 = vmatpush3.bf16.msra.mxu0 %v2470_v21  ;;  %2971 = vst [vmem:[#allocation6_spill] sm:$0xff] %v2704_v62  ;;  %v2710_v63 = vld [vmem:[%s2955_s2 + $0x1b0] sm:$0xff]  }
  0x25   : > { %1897 = vmatprep.subr.bf16.mxu0 %v2488_v24  ;;  %2972 = vst [vmem:[#allocation7_spill] sm:$0xff] %v2710_v63  ;;  %v2215_v36 = vld [vmem:[%s2520_s9 + $0x10] ss:$36 sps:$4 sm:$0xff]  }
  0x26   : > { %1918 = vmatpush3.bf16.msra.mxu1 %v2482_v23 }
  0x27   : > { %1919 = vmatprep.subr.bf16.mxu1 %v2501_v26 }
  0x28   : > { %1898 = vmatpush3.bf16.msra.mxu0 %v2495_v25 }
  0x29   : > { %1899 = vmatprep.subr.bf16.mxu0 %v2513_v28 }
  0x2a   : > { %1920 = vmatpush3.bf16.msra.mxu1 %v2507_v27 }
  0x2b   : > { %1921 = vmatprep.subr.bf16.mxu1 %v2532_v30 }
  0x2c   : > { %1900 = vmatpush3.bf16.msra.mxu0 %v2526_v29 }
  0x2d   : > { %1929 = vmatprep.subr.bf16.mxu0 %v2546_v34 }
  0x2e   : > { %1922 = vmatpush3.bf16.msra.mxu1 %v2541_v33 }
  0x2f   : > { %1066 = vmatmul.mubr.bf16.vlgmr.msra.gmra.mrb[0].mxu0 %v2177_v31  ;;  %1951 = vmatprep.subr.bf16.mxu1 %v2560_v38  ;;  %v2716_v31 = vld [vmem:[%s2955_s2 + $0x178] sm:$0xff]  }
  0x30   : > { %1930 = vmatpush3.bf16.msra.mxu0 %v2555_v37 }
  0x31   : > { %1107 = vmatmul.mubr.bf16.vlgmr.msra.gmra.mrb[0].mxu1 %v2182_v35  ;;  %1931 = vmatprep.subr.bf16.mxu0 %v2572_v40  ;;  %v2728_v35 = vld [vmem:[%s2955_s2 + $0x1f8] sm:$0xff]  }
  0x32   : > { %1952 = vmatpush3.bf16.msra.mxu1 %v2566_v39 }
  0x33   : > { %1953 = vmatprep.subr.bf16.mxu1 %v2584_v42 }
  0x34   : > { %1932 = vmatpush3.bf16.msra.mxu0 %v2578_v41 }
  0x35   : > { %1933 = vmatprep.subr.bf16.mxu0 %v2596_v44 }
  0x36   : > { %1954 = vmatpush3.bf16.msra.mxu1 %v2590_v43 }
  0x37   : > { %1955 = vmatprep.subr.bf16.mxu1 %v2608_v46 }
  0x38   : > { %1934 = vmatpush3.bf16.msra.mxu0 %v2602_v45 }
  0x39   : > { %1935 = vmatprep.subr.bf16.mxu0 %v2620_v48 }
  0x3a   : > { %1956 = vmatpush3.bf16.msra.mxu1 %v2614_v47 }
  0x3b   : > { %1957 = vmatprep.subr.bf16.mxu1 %v2632_v50 }
  0x3c   : > { %1936 = vmatpush3.bf16.msra.mxu0 %v2626_v49 }
  0x3d   : > { %1937 = vmatprep.subr.bf16.mxu0 %v2644_v52 }
  0x3e   : > { %1958 = vmatpush3.bf16.msra.mxu1 %v2638_v51 }
  0x3f   : > { %1959 = vmatprep.subr.bf16.mxu1 %v2656_v54  ;;  %v2746_v54 = vld [vmem:[%s2955_s2 + $0x200] sm:$0xff]  }
  0x40   : > { %1938 = vmatpush3.bf16.msra.mxu0 %v2650_v53 }
  0x41   : > { %1939 = vmatprep.subr.bf16.mxu0 %v2668_v56 }
  0x42   : > { %1960 = vmatpush3.bf16.msra.mxu1 %v2662_v55  ;;  %v2221_v55 = vld [vmem:[%s2520_s9 + $0x1c] ss:$36 sps:$4 sm:$0xff]  }
  0x43   : > { %1961 = vmatprep.subr.bf16.mxu1 %v2680_v58  ;;  %v2219_v58 = vld [vmem:[%s2520_s9 + $0x18] ss:$36 sps:$4 sm:$0xff]   ;;  %1188 = vmatprep.mubr.bf16.mxu1 %v2221_v55 }
  0x44   : > { %1940 = vmatpush3.bf16.msra.mxu0 %v2674_v57 }
  0x45   : > { %1941 = vmatprep.subr.bf16.mxu0 %v2692_v60 }
  0x46   : > { %1962 = vmatpush3.bf16.msra.mxu1 %v2686_v59  ;;  %v2276_v59 = vmov 0.0  }
  0x47   : > { %1963 = vmatprep.subr.bf16.mxu1 %v2704_v62  ;;  %v2217_v62 = vld [vmem:[%s2520_s9 + $0x14] ss:$36 sps:$4 sm:$0xff]   ;;  %1570 = vst [vmem:[%s2933_s17] sm:$0x1] %v2276_v59 }
  0x48   : > { %1942 = vmatpush3.bf16.msra.mxu0 %v2698_v61  ;;  %1147 = vmatprep.mubr.bf16.mxu0 %v2217_v62  ;;  %v2755_v62 = vld [vmem:[%s2955_s2 + $0x208] sm:$0xff]  }
  0x49   : > { %1943 = vmatprep.subr.bf16.mxu0 %v2716_v31 }
  0x4a   : > { %1964 = vmatpush3.bf16.msra.mxu1 %v2710_v63  ;;  %v2737_v63 = vld [vmem:[%s2955_s2 + $0x1b8] sm:$0xff]  }
  0x4b   : > { %1965 = vmatprep.subr.bf16.mxu1 %v2728_v35 }
  0x4c   : > { %1944 = vmatpush3.bf16.msra.mxu0 %v2722_v32 }
  0x4d   : > { %2079 = vmatprep.subr.bf16.mxu0 %v2276_v59 }
  0x4e   : > { %1966 = vmatpush3.bf16.msra.mxu1 %v2737_v63 }
  0x4f   : > { %1148 = vmatmul.mubr.bf16.vlgmr.msra.gmra.mrb[4].mxu0 %v2215_v36  ;;  %1982 = vmatprep.subr.bf16.mxu1 %v2341_v0  ;;  %v2764_v0 = vld [vmem:[%s2955_s2 + $0x210] sm:$0xff]  }
  0x50   : > { %2095 = vmatprep.mubr.msk.bf16.mxu0 %vm2277_vm0, %v2276_v59  ;;  %2080 = vmatpush3.bf16.msra.mxu0 %v2746_v54 }
  0x51   : > { %1189 = vmatmul.mubr.bf16.vlgmr.msra.gmra.mrb[4].mxu1 %v2219_v58  ;;  %2081 = vmatprep.subr.bf16.mxu0 %v2276_v59 }
  0x52   : > { %1983 = vmatpush3.bf16.msra.mxu1 %v2346_v1  ;;  %v2233_v1 = vld [vmem:[%s2771_s21 + $0x4] ss:$36 sps:$4 sm:$0xff]  }
  0x53   : > { %1984 = vmatprep.subr.bf16.mxu1 %v2364_v4  ;;  %v2781_v4 = vld [vmem:[%s2955_s2 + $0x218] sm:$0xff]   ;;  %1328 = vmatprep.mubr.bf16.mxu1 %v2233_v1 }
  0x54   : > { %2082 = vmatpush3.bf16.msra.mxu0 %v2755_v62 }
  0x55   : > { %2083 = vmatprep.subr.bf16.mxu0 %v2276_v59 }
  0x56   : > { %1985 = vmatpush3.bf16.msra.mxu1 %v2370_v5  ;;  %v2790_v5 = vld [vmem:[%s2955_s2 + $0x220] sm:$0xff]  }
  0x57   : > { %1986 = vmatprep.subr.bf16.mxu1 %v2388_v8  ;;  %v2799_v8 = vld [vmem:[%s2955_s2 + $0x228] sm:$0xff]  }
  0x58   : > { %2084 = vmatpush3.bf16.msra.mxu0 %v2764_v0 }
  0x59   : > { %2085 = vmatprep.subr.bf16.mxu0 %v2276_v59 }
  0x5a   : > { %1987 = vmatpush3.bf16.msra.mxu1 %v2394_v9  ;;  %v2808_v9 = vld [vmem:[%s2955_s2 + $0x230] sm:$0xff]  }
  0x5b   : > { %1988 = vmatprep.subr.bf16.mxu1 %v2412_v12  ;;  %v2817_v12 = vld [vmem:[%s2955_s2 + $0x238] sm:$0xff]  }
  0x5c   : > { %2086 = vmatpush3.bf16.msra.mxu0 %v2781_v4 }
  0x5d   : > { %2087 = vmatprep.subr.bf16.mxu0 %v2276_v59 }
  0x5e   : > { %1989 = vmatpush3.bf16.msra.mxu1 %v2418_v13  ;;  %v2230_v13 = vld [vmem:[%s2520_s9 + $0x20] ss:$36 sps:$4 sm:$0xff]  }
  0x5f   : > { %1990 = vmatprep.subr.bf16.mxu1 %v2436_v16  ;;  %v2231_v16 = vld [vmem:[%s2771_s21] ss:$36 sps:$4 sm:$0xff]  }
  0x60   : > { %2088 = vmatpush3.bf16.msra.mxu0 %v2790_v5 }
  0x61   : > { %2089 = vmatprep.subr.bf16.mxu0 %v2276_v59 }
  0x62   : > { %1991 = vmatpush3.bf16.msra.mxu1 %v2443_v17  ;;  %v2236_v17 = vld [vmem:[%s2771_s21 + $0xc] ss:$36 sps:$4 sm:$0xff]  }
  0x63   : > { %1992 = vmatprep.subr.bf16.mxu1 %v2461_v20  ;;  %v2239_v20 = vld [vmem:[%s2771_s21 + $0x14] ss:$36 sps:$4 sm:$0xff]  }
  0x64   : > { %2090 = vmatpush3.bf16.msra.mxu0 %v2799_v8 }
  0x65   : > { %2091 = vmatprep.subr.bf16.mxu0 %v2276_v59 }
  0x66   : > { %1993 = vmatpush3.bf16.msra.mxu1 %v2470_v21  ;;  %v2243_v21 = vld [vmem:[%s2771_s21 + $0x20] ss:$36 sps:$4 sm:$0xff]  }
  0x67   : > { %1994 = vmatprep.subr.bf16.mxu1 %v2488_v24 }
  0x68   : > { %2092 = vmatpush3.bf16.msra.mxu0 %v2808_v9 }
  0x69   : > { %2093 = vmatprep.subr.bf16.mxu0 %v2276_v59 }
  0x6a   : > { %1995 = vmatpush3.bf16.msra.mxu1 %v2495_v25 }
  0x6b   : > { %1996 = vmatprep.subr.bf16.mxu1 %v2513_v28 }
  0x6c   : > { %2094 = vmatpush3.bf16.msra.mxu0 %v2817_v12 }
  0x6d   : > { %2004 = vmatprep.subr.bf16.mxu0 %v2352_v2  ;;  %v2234_v2 = vld [vmem:[%s2771_s21 + $0x8] ss:$36 sps:$4 sm:$0xff]  }
  0x6e   : > { %1997 = vmatpush3.bf16.msra.mxu1 %v2526_v29 }
  0x6f   : > { %2026 = vmatprep.subr.bf16.mxu1 %v2546_v34  ;;  %2096 = vmatmul.mubr.bf16.vlgmr.msra.gmra.mrb[8].mxu0 %v2230_v13 }
  0x70   : > { %2005 = vmatpush3.bf16.msra.mxu0 %v2358_v3  ;;  %1369 = vmatprep.mubr.bf16.mxu0 %v2236_v17  ;;  %v2237_v3 = vld [vmem:[%s2771_s21 + $0x10] ss:$36 sps:$4 sm:$0xff]  }
  0x71   : > { %1329 = vmatmul.mubr.bf16.vlgmr.msra.gmra.mrb[8].mxu1 %v2231_v16  ;;  %2006 = vmatprep.subr.bf16.mxu0 %v2376_v6  ;;  %v2242_v6 = vld [vmem:[%s2771_s21 + $0x1c] ss:$36 sps:$4 sm:$0xff]  }
  0x72   : > { %2027 = vmatpush3.bf16.msra.mxu1 %v2555_v37  ;;  %1410 = vmatprep.mubr.bf16.mxu1 %v2239_v20 }
  0x73   : > { %2028 = vmatprep.subr.bf16.mxu1 %v2572_v40 }
  0x74   : > { %2007 = vmatpush3.bf16.msra.mxu0 %v2382_v7  ;;  %v2973_v7 = vld [vmem:[#allocation2_spill] sm:$0xff] }
  0x75   : > { %2008 = vmatprep.subr.bf16.mxu0 %v2400_v10  ;;  %v2974_v10 = vld [vmem:[#allocation3_spill] sm:$0xff] }
  0x76   : > { %2029 = vmatpush3.bf16.msra.mxu1 %v2578_v41 }
  0x77   : > { %2030 = vmatprep.subr.bf16.mxu1 %v2596_v44 }
  0x78   : > { %2009 = vmatpush3.bf16.msra.mxu0 %v2406_v11  ;;  %v2975_v11 = vld [vmem:[#allocation4_spill] sm:$0xff] }
  0x79   : > { %2010 = vmatprep.subr.bf16.mxu0 %v2424_v14  ;;  %v2976_v14 = vld [vmem:[#allocation5_spill] sm:$0xff] }
  0x7a   : > { %2031 = vmatpush3.bf16.msra.mxu1 %v2602_v45 }
  0x7b   : > { %2032 = vmatprep.subr.bf16.mxu1 %v2620_v48 }
  0x7c   : > { %2011 = vmatpush3.bf16.msra.mxu0 %v2430_v15  ;;  %v2977_v15 = vld [vmem:[#allocation6_spill] sm:$0xff] }
  0x7d   : > { %2012 = vmatprep.subr.bf16.mxu0 %v2449_v18  ;;  %v2978_v18 = vld [vmem:[#allocation7_spill] sm:$0xff] }
  0x7e   : > { %2033 = vmatpush3.bf16.msra.mxu1 %v2626_v49 }
  0x7f   : > { %2034 = vmatprep.subr.bf16.mxu1 %v2644_v52 }
  0x80   : > { %2013 = vmatpush3.bf16.msra.mxu0 %v2455_v19  ;;  %v2240_v19 = vld [vmem:[%s2771_s21 + $0x18] ss:$36 sps:$4 sm:$0xff]   ;;  %s387_s21 = scalar_lea.vmem %s2959_s6, %s1869_s14 }
  0x81   : > { %2014 = vmatprep.subr.bf16.mxu0 %v2476_v22 }
  0x82   : > { %2035 = vmatpush3.bf16.msra.mxu1 %v2650_v53 }
  0x83   : > { %2036 = vmatprep.subr.bf16.mxu1 %v2668_v56 }
  0x84   : > { %2015 = vmatpush3.bf16.msra.mxu0 %v2482_v23  ;;  %v2902_v23 = vld [vmem:[%s2956_s3] ss:$0 sm:$0xff] }
  0x85   : > { %2016 = vmatprep.subr.bf16.mxu0 %v2501_v26 }
  0x86   : > { %2037 = vmatpush3.bf16.msra.mxu1 %v2674_v57 }
  0x87   : > { %2038 = vmatprep.subr.bf16.mxu1 %v2692_v60 }
  0x88   : > { %2017 = vmatpush3.bf16.msra.mxu0 %v2507_v27 }
  0x89   : > { %2018 = vmatprep.subr.bf16.mxu0 %v2532_v30 }
  0x8a   : > { %2039 = vmatpush3.bf16.msra.mxu1 %v2698_v61 }
  0x8b   : > { %2040 = vmatprep.subr.bf16.mxu1 %v2716_v31 }
  0x8c   : > { %2019 = vmatpush3.bf16.msra.mxu0 %v2541_v33 }
  0x8d   : > { %2048 = vmatprep.subr.bf16.mxu0 %v2560_v38 }
  0x8e   : > { %2041 = vmatpush3.bf16.msra.mxu1 %v2722_v32 }
  0x8f   : > { %2099 = vmatprep.subr.bf16.mxu1 %v2276_v59  ;;  %1370 = vmatmul.mubr.bf16.vlgmr.msra.gmra.mrb[12].mxu0 %v2234_v2 }
  0x90   : > { %2049 = vmatpush3.bf16.msra.mxu0 %v2566_v39  ;;  %1451 = vmatprep.mubr.bf16.mxu0 %v2242_v6 }
  0x91   : > { %1411 = vmatmul.mubr.bf16.vlgmr.msra.gmra.mrb[12].mxu1 %v2237_v3  ;;  %2050 = vmatprep.subr.bf16.mxu0 %v2584_v42 }
  0x92   : > { %2100 = vmatpush3.bf16.msra.mxu1 %v2746_v54  ;;  %2115 = vmatprep.mubr.msk.bf16.mxu1 %vm2277_vm0, %v2276_v59 }
  0x93   : > { %2101 = vmatprep.subr.bf16.mxu1 %v2276_v59 }
  0x94   : > { %2051 = vmatpush3.bf16.msra.mxu0 %v2590_v43 }
  0x95   : > { %2052 = vmatprep.subr.bf16.mxu0 %v2608_v46 }
  0x96   : > { %2102 = vmatpush3.bf16.msra.mxu1 %v2755_v62 }
  0x97   : > { %2103 = vmatprep.subr.bf16.mxu1 %v2276_v59 }
  0x98   : > { %2053 = vmatpush3.bf16.msra.mxu0 %v2614_v47 }
  0x99   : > { %2054 = vmatprep.subr.bf16.mxu0 %v2632_v50 }
  0x9a   : > { %2104 = vmatpush3.bf16.msra.mxu1 %v2764_v0 }
  0x9b   : > { %2105 = vmatprep.subr.bf16.mxu1 %v2276_v59 }
  0x9c   : > { %2055 = vmatpush3.bf16.msra.mxu0 %v2638_v51 }
  0x9d   : > { %2056 = vmatprep.subr.bf16.mxu0 %v2973_v7 }
  0x9e   : > { %2106 = vmatpush3.bf16.msra.mxu1 %v2781_v4 }
  0x9f   : > { %2107 = vmatprep.subr.bf16.mxu1 %v2276_v59 }
  0xa0   : > { %2057 = vmatpush3.bf16.msra.mxu0 %v2974_v10 }
  0xa1   : > { %2058 = vmatprep.subr.bf16.mxu0 %v2975_v11 }
  0xa2   : > { %2108 = vmatpush3.bf16.msra.mxu1 %v2790_v5 }
  0xa3   : > { %2109 = vmatprep.subr.bf16.mxu1 %v2276_v59 }
  0xa4   : > { %2059 = vmatpush3.bf16.msra.mxu0 %v2976_v14 }
  0xa5   : > { %2060 = vmatprep.subr.bf16.mxu0 %v2977_v15 }
  0xa6   : > { %2110 = vmatpush3.bf16.msra.mxu1 %v2799_v8 }
  0xa7   : > { %2111 = vmatprep.subr.bf16.mxu1 %v2276_v59 }
  0xa8   : > { %2061 = vmatpush3.bf16.msra.mxu0 %v2978_v18 }
  0xa9   : > { %2062 = vmatprep.subr.bf16.mxu0 %v2728_v35 }
  0xaa   : > { %2112 = vmatpush3.bf16.msra.mxu1 %v2808_v9 }
  0xab   : > { %2113 = vmatprep.subr.bf16.mxu1 %v2276_v59 }
  0xac   : > { %2063 = vmatpush3.bf16.msra.mxu0 %v2737_v63 }
  0xae   : > { %2114 = vmatpush3.bf16.msra.mxu1 %v2817_v12 }
  0xaf   : > { %1452 = vmatmul.mubr.bf16.vlgmr.msra.gmra.mrb[16].mxu0 %v2240_v19 }
  0xb1   : > { %2116 = vmatmul.mubr.bf16.vlgmr.msra.gmra.mrb[16].mxu1 %v2243_v21 }
 0x102   : > { %v1901_v22 = vpop.f32.mrb[0].mxu0 }
 0x103   : > { %v1902_v24 = vpop.f32.mrb[1].mxu0 }
 0x104   : > { %v1903_v25 = vadd.f32 %v1902_v24, %v1901_v22  ;;  %v1904_v26 = vpop.f32.mrb[2].mxu0  ;;  %v1923_v27 = vpop.f32.mrb[0].mxu1 }
 0x105   : > { %v1905_v28 = vpop.f32.mrb[3].mxu0  ;;  %v1924_v33 = vpop.f32.mrb[1].mxu1 }
 0x106   : > { %v1068_v29 = vadd.f32 %v1903_v25, %v2902_v23  ;;  %v1906_v30 = vadd.f32 %v1905_v28, %v1904_v26  ;;  %v1925_v34 = vadd.f32 %v1924_v33, %v1923_v27  ;;  %v1926_v37 = vpop.f32.mrb[2].mxu1 }
 0x107   : > { %v1927_v39 = vpop.f32.mrb[3].mxu1 }
 0x108   : > { %v1071_v38 = vadd.f32 %v1906_v30, %v2902_v23  ;;  %v1109_v40 = vadd.f32 %v1925_v34, %v1068_v29  ;;  %v1928_v41 = vadd.f32 %v1927_v39, %v1926_v37 }
 0x10a   : > { %v1112_v42 = vadd.f32 %v1928_v41, %v1071_v38 }
 0x122   : > { %v1945_v43 = vpop.f32.mrb[4].mxu0 }
 0x123   : > { %v1946_v44 = vpop.f32.mrb[5].mxu0 }
 0x124   : > { %v1947_v45 = vadd.f32 %v1946_v44, %v1945_v43  ;;  %v1948_v46 = vpop.f32.mrb[6].mxu0  ;;  %v1967_v47 = vpop.f32.mrb[4].mxu1 }
 0x125   : > { %v1949_v48 = vpop.f32.mrb[7].mxu0  ;;  %v1968_v51 = vpop.f32.mrb[5].mxu1 }
 0x126   : > { %v1150_v49 = vadd.f32 %v1947_v45, %v1109_v40  ;;  %v1950_v50 = vadd.f32 %v1949_v48, %v1948_v46  ;;  %v1969_v52 = vadd.f32 %v1968_v51, %v1967_v47  ;;  %v1970_v53 = vpop.f32.mrb[6].mxu1 }
 0x127   : > { %v1971_v55 = vpop.f32.mrb[7].mxu1 }
 0x128   : > { %v1153_v54 = vadd.f32 %v1950_v50, %v1112_v42  ;;  %v1972_v56 = vadd.f32 %v1971_v55, %v1970_v53  ;;  %v1191_v57 = vadd.f32 %v1969_v52, %v1150_v49 }
 0x12a   : > { %v1194_v58 = vadd.f32 %v1972_v56, %v1153_v54 }
 0x142   : > { %v1231_v60 = vpop.f32.mrb[8].mxu0 }
 0x143   : > { %v1232_v61 = vadd.f32 %v1231_v60, %v1191_v57  ;;  %v2097_v63 = vpop.f32.mrb[9].mxu0 }
 0x144   : > { %v1998_v31 = vpop.f32.mrb[8].mxu1  ;;  %v1234_v32 = vpop.f32.mrb[10].mxu0 }
 0x145   : > { %v1999_v35 = vpop.f32.mrb[9].mxu1  ;;  %v2906_v36 = vmax.f32 %v1232_v61, 0.0  ;;  %v1235_v62 = vadd.f32 %v1234_v32, %v1194_v58  ;;  %v2098_v0 = vpop.f32.mrb[11].mxu0 }
 0x146   : > { %v2000_v1 = vadd.f32 %v1999_v35, %v1998_v31  ;;  %v2001_v4 = vpop.f32.mrb[10].mxu1 }
 0x147   : > { %v2002_v5 = vpop.f32.mrb[11].mxu1  ;;  %v2909_v8 = vmax.f32 %v1235_v62, 0.0  ;;  %v1523_v12 = vmul.f32 %v2906_v36, %v2906_v36 }
 0x148   : > { %v2003_v9 = vadd.f32 %v2002_v5, %v2001_v4  ;;  %v1331_v3 = vadd.f32 %v2000_v1, %v2902_v23  ;;  %v1866_v4 = vld [vmem:[%s2957_s4] ss:$0 sm:$0xff] }
 0x149   : > { %v1878_v13 = vpack.c.bf16 %v2909_v8, %v2906_v36  ;;  %1525 = vadd.xlane.f32.xlu0 %v1523_v12  ;;  %v1524_v16 = vmul.f32 %v2909_v8, %v2909_v8 }
 0x14a   : > { %v1334_v18 = vadd.f32 %v2003_v9, %v2902_v23 }
 0x14b   : > { %1879 = vst [vmem:[%s377_s18] sm:$0xff] %v1878_v13  }
 0x14d   : > { %1527 = vadd.xlane.f32.xlu0 %v1524_v16 }
 0x162   : > { %v2020_v17 = vpop.f32.mrb[12].mxu0 }
 0x163   : > { %v2021_v20 = vpop.f32.mrb[13].mxu0 }
 0x164   : > { %v2042_v2 = vpop.f32.mrb[12].mxu1  ;;  %v2022_v6 = vadd.f32 %v2021_v20, %v2020_v17  ;;  %v2023_v7 = vpop.f32.mrb[14].mxu0 }
 0x165   : > { %v2043_v10 = vpop.f32.mrb[13].mxu1  ;;  %v2024_v11 = vpop.f32.mrb[15].mxu0 }
 0x166   : > { %v2044_v14 = vadd.f32 %v2043_v10, %v2042_v2  ;;  %v2045_v15 = vpop.f32.mrb[14].mxu1  ;;  %v1372_v19 = vadd.f32 %v2022_v6, %v1331_v3  ;;  %v2025_v21 = vadd.f32 %v2024_v11, %v2023_v7  ;;  %v1571_v3 = vld [vmem:[%s2933_s17] sm:$0x1] }
 0x167   : > { %v2046_v22 = vpop.f32.mrb[15].mxu1 }
 0x168   : > { %v2047_v24 = vadd.f32 %v2046_v22, %v2045_v15  ;;  %v1375_v25 = vadd.f32 %v2025_v21, %v1334_v18  ;;  %v1413_v26 = vadd.f32 %v2044_v14, %v1372_v19 }
 0x16a   : > { %v1416_v27 = vadd.f32 %v2047_v24, %v1375_v25 }
 0x182   : > { %v2064_v28 = vpop.f32.mrb[16].mxu0 }
 0x183   : > { %v2065_v29 = vpop.f32.mrb[17].mxu0 }
 0x184   : > { %v1494_v30 = vpop.f32.mrb[16].mxu1  ;;  %v2066_v33 = vadd.f32 %v2065_v29, %v2064_v28  ;;  %v2067_v34 = vpop.f32.mrb[18].mxu0 }
 0x185   : > { %v2117_v37 = vpop.f32.mrb[17].mxu1  ;;  %v2068_v38 = vpop.f32.mrb[19].mxu0 }
 0x186   : > { %v1497_v39 = vpop.f32.mrb[18].mxu1  ;;  %v1454_v40 = vadd.f32 %v2066_v33, %v1413_v26  ;;  %v2069_v41 = vadd.f32 %v2068_v38, %v2067_v34 }
 0x187   : > { %v2118_v23 = vpop.f32.mrb[19].mxu1 }
 0x188   : > { %v1495_v42 = vadd.f32 %v1494_v30, %v1454_v40  ;;  %v1457_v43 = vadd.f32 %v2069_v41, %v1416_v27 }
 0x18a   : > { %v1501_v44 = vmax.f32 %v1495_v42, 0.0  ;;  %v1498_v45 = vadd.f32 %v1497_v39, %v1457_v43 }
 0x18c   : > { %v1502_v46 = vmax.f32 %v1498_v45, 0.0  ;;  %v1535_v47 = vmul.f32 %v1501_v44, %v1501_v44 }
 0x18e   : > { %v1883_v48 = vpack.c.bf16 %v1502_v46, %v1501_v44  ;;  %1537 = vadd.xlane.f32.xlu1 %v1535_v47  ;;  %v1536_v49 = vmul.f32 %v1502_v46, %v1502_v46 }
 0x190   : > { %1884 = vst [vmem:[%s387_s21] sm:$0xff] %v1883_v48  }
 0x192   : > { %1539 = vadd.xlane.f32.xlu1 %v1536_v49 }
 0x1d6   : > { %v1526_v50 = vpop.xlane.xlu0 %1525 }
 0x1d7   : > { %v1529_v51 = vadd.f32 1e-20, %v1526_v50 }
 0x1d9   : > { %2244 = vrsqrt.f32 %v1529_v51 }
 0x1da   : > { %v1528_v52 = vpop.xlane.xlu0 %1527 }
 0x1db   : > { %v1530_v54 = vadd.f32 1e-20, %v1528_v52 }
 0x1e3   : > { %v2245_v58 = vpop.eup %2244 }
 0x1e4   : > { %v1533_v61 = vmul.f32 %v2245_v58, %v2906_v36 }
 0x21b   : > { %v1538_v53 = vpop.xlane.xlu1 %1537 }
 0x21c   : > { %v1541_v55 = vadd.f32 1e-20, %v1538_v53 }
 0x21e   : > { %2246 = vrsqrt.f32 %v1541_v55 }
 0x21f   : > { %v1540_v56 = vpop.xlane.xlu1 %1539  ;;  %2248 = vrsqrt.f32 %v1530_v54 }
 0x220   : > { %v1542_v57 = vadd.f32 1e-20, %v1540_v56 }
 0x222   : > { %2250 = vrsqrt.f32 %v1542_v57 }
 0x228   : > { %v2247_v60 = vpop.eup %2246 }
 0x229   : > { %v1545_v63 = vmul.f32 %v2247_v60, %v1501_v44  ;;  %v2249_v31 = vpop.eup %2248 }
 0x22a   : > { %v1534_v35 = vmul.f32 %v2249_v31, %v2909_v8 }
 0x22b   : > { %v1547_v32 = vsub.f32 %v1533_v61, %v1545_v63 }
 0x22c   : > { %v2251_v59 = vpop.eup %2250 }
 0x22d   : > { %v1546_v62 = vmul.f32 %v2251_v59, %v1502_v46  ;;  %v1549_v0 = vmul.f32 %v1547_v32, %v1547_v32 }
 0x22f   : > { %v1548_v1 = vsub.f32 %v1534_v35, %v1546_v62  ;;  %v1557_v9 = vmul.f32 %v1866_v4, %v1549_v0 }
 0x231   : > { %v1550_v5 = vmul.f32 %v1548_v1, %v1548_v1 }
 0x233   : > { %v1558_v12 = vmul.f32 %v1866_v4, %v1550_v5 }
 0x235   : > { %v1559_v13 = vadd.f32 %v1558_v12, %v1557_v9 }
 0x237   : > { %v1560_v36 = vrot.slane %v1559_v13, 4 }
 0x239   : > { %v1561_v16 = vadd.f32 %v1560_v36, %v1559_v13 }
 0x23b   : > { %v1562_v17 = vrot.slane %v1561_v16, 2 }
 0x23d   : > { %v1563_v20 = vadd.f32 %v1562_v17, %v1561_v16 }
 0x23f   : > { %v1564_v2 = vrot.slane %v1563_v20, 1 }
 0x241   : > { %v1565_v6 = vadd.f32 %v1564_v2, %v1563_v20 }
 0x243   : > { %v1572_v8 = vadd.f32 %v1571_v3, %v1565_v6 }
 0x245   : > { %1573 = vst [vmem:[%s2933_s17] sm:$0x1] %v1572_v8 }
 0x246 PF: > { %s18_s26 = sadd.s32 1, %s2274_s26   ;;  %s2979_s24 = smov %s2270_s25 }
 0x247   : > { %p15_p5 = scmp.ge.s32.totalorder %s18_s26, 4   ;;  %s2980_s25 = smov %s2982_s27 }
 0x249   :  { %17 = sbr.rel (!%p15_p5) target bundleno = 2 (0x2), region = 101 }

</bundles_post_ra>
